<compile_context>
chip_gen: v7x
topology: tpu7x:2x2x1
jax: 0.10.0
libtpu: 0.0.40
codegen_flags: <defaults>
</compile_context>

<pallas_src>
import functools

import numpy as np
import jax
import jax.numpy as jnp
from jax import lax
from jax.experimental import pallas as pl
from jax.experimental.pallas import tpu as pltpu


# ----------------------------------------------------------------------------
# Fully fused kernel: combined conv -> keypoints -> heat maps -> transport ->
# one-hot gather -> occupancy MLP.  One grid step per batch item.
# TODO(synk): at larger reso_grid (e.g. 64^3) the (D,S) / (S,Tpad) blocks must
#             be tiled over S to fit v7x's 64 MiB VMEM; whole-block is fine at 8^3.
# ----------------------------------------------------------------------------
def _fused_kernel(x_ref, w_ref, b_ref, cs3_ref, c3s_ref, idx_ref, p_ref,
                  w1_ref, b1_ref, w2_ref, b2_ref, kps_ref, occ_ref,
                  *, Gn, K, D, E_off, S, Tpad, inv_std2):
    # --- single combined 1x1x1 conv (kp head + encoder head) over all grids --
    x = x_ref[0]                                                   # (Cin, Gn*S)
    y = jnp.dot(w_ref[...], x, preferred_element_type=jnp.float32) + b_ref[...]

    # --- keypoints: softmax stats + one (K,S)x(S,3) MXU matmul per grid ------
    kp_rows = y[0:K]                                               # (K, Gn*S)
    kp_vals = []
    for g in range(Gn):                                            # Gn small/static
        kp_g = kp_rows[:, g * S:(g + 1) * S]                       # (K, S)
        m = jnp.max(kp_g, axis=-1, keepdims=True)
        e = jnp.exp(kp_g - m)
        denom = jnp.sum(e, axis=-1, keepdims=True)                 # (K, 1)
        kxyz = jnp.dot(e, cs3_ref[...],
                       preferred_element_type=jnp.float32) / denom  # (K, 3)
        kps_ref[0, g] = kxyz                                       # one (K,3) store
        kp_vals.append(kxyz)

    # --- transport with fused gaussian heat maps (vectorized over K) --------
    c1 = y[E_off:E_off + D, 0:S]                                   # (D, S)
    c2 = y[E_off:E_off + D, S:2 * S]                               # (D, S)
    cx = c3s_ref[0:1]                                              # (1, S)
    cy = c3s_ref[1:2]
    cz = c3s_ref[2:3]

    def heat(kxyz):
        kx = kxyz[:, 0:1]
        ky = kxyz[:, 1:2]
        kz = kxyz[:, 2:3]
        d2 = (cx - kx) ** 2 + (cy - ky) ** 2 + (cz - kz) ** 2      # (K, S)
        return jnp.exp(-d2 * inv_std2)

    s_heat = heat(kp_vals[0])
    t_heat = heat(kp_vals[1])
    # factored recurrence: out = coefA*c1 + coefB*c2, applied to (D,S) once
    coefA = (1.0 - s_heat[0:1]) * (1.0 - t_heat[0:1])              # (1, S)
    coefB = t_heat[0:1]
    for k in range(1, K):
        a_k = (1.0 - s_heat[k:k + 1]) * (1.0 - t_heat[k:k + 1])
        coefA = a_k * coefA
        coefB = a_k * coefB + t_heat[k:k + 1]
    c12 = coefA * c1 + coefB * c2                                  # (D, S)

    # --- occupancy decode for BOTH grids: shared one-hot gather + 2-layer MLP
    io = lax.broadcasted_iota(jnp.int32, (S, Tpad), 0)             # built once
    onehot = (io == idx_ref[0]).astype(jnp.float32)                # (S, Tpad)
    feat12 = jnp.dot(c12, onehot, preferred_element_type=jnp.float32)  # (D, Tpad)
    feat2 = jnp.dot(c2, onehot, preferred_element_type=jnp.float32)
    pT = p_ref[0]                                                  # (3, Tpad)
    xx = jnp.concatenate(
        [jnp.concatenate([feat12, pT], axis=0),
         jnp.concatenate([feat2, pT], axis=0)], axis=1)            # (D+3, 2*Tpad)
    h = jnp.maximum(
        jnp.dot(w1_ref[...], xx, preferred_element_type=jnp.float32) + b1_ref[...],
        0.0)                                                       # (Hd, 2*Tpad)
    logit = jnp.dot(w2_ref[...], h, preferred_element_type=jnp.float32) + b2_ref[...]
    occ_ref[0] = 1.0 / (1.0 + jnp.exp(-logit))                     # lane-dense store


# ----------------------------------------------------------------------------
# Keypoints-only kernel (used when p is None).
# ----------------------------------------------------------------------------
def _kps_only_kernel(x_ref, w_ref, b_ref, cs3_ref, kps_ref, *, Gn, K, S):
    x = x_ref[0]                                                   # (Cin, Gn*S)
    y = jnp.dot(w_ref[...], x, preferred_element_type=jnp.float32) + b_ref[...]
    for g in range(Gn):
        kp_g = y[:, g * S:(g + 1) * S]
        m = jnp.max(kp_g, axis=-1, keepdims=True)
        e = jnp.exp(kp_g - m)
        denom = jnp.sum(e, axis=-1, keepdims=True)
        kps_ref[0, g] = jnp.dot(e, cs3_ref[...],
                                preferred_element_type=jnp.float32) / denom


# ----------------------------------------------------------------------------
# Transporter module (forward pass only).
# ----------------------------------------------------------------------------
class TransporterPallas:
    def __init__(self, c_in=4, c_dim=8, k_dim=4, reso_grid=(8, 8, 8),
                 std=0.2, hidden=32, sigmoid=True, key=None):
        self.reso_grid = tuple(reso_grid)
        Z, H, W = self.reso_grid
        self.S = Z * H * W
        self.dim_size = self.S
        self.std = std
        self.sigmoid = sigmoid
        if key is None:
            key = jax.random.PRNGKey(42)
        ks = jax.random.split(key, 8)
        # TODO(synk): encoders in the original are external point-cloud voxel
        #             encoders; stand-in is a deterministic 1x1x1 conv.
        self.enc_w = 0.5 * jax.random.normal(ks[0], (c_dim, c_in), jnp.float32)
        self.enc_b = 0.1 * jax.random.normal(ks[1], (c_dim, 1), jnp.float32)
        self.kp_w = 0.5 * jax.random.normal(ks[2], (k_dim, c_in), jnp.float32)
        self.kp_b = 0.1 * jax.random.normal(ks[3], (k_dim, 1), jnp.float32)
        din = c_dim + 3
        # decoder weights stored "hidden-major" so the fused kernel keeps the
        # point axis on lanes with no in-kernel transposes.
        self.dec_w1 = 0.3 * jax.random.normal(ks[4], (hidden, din), jnp.float32)
        self.dec_b1 = 0.1 * jax.random.normal(ks[5], (hidden, 1), jnp.float32)
        self.dec_w2 = 0.3 * jax.random.normal(ks[6], (1, hidden), jnp.float32)
        self.dec_b2 = 0.1 * jax.random.normal(ks[7], (1, 1), jnp.float32)
        # combined (kp | enc) weight, enc rows padded to an 8-sublane boundary
        # so the in-kernel row slices are tile aligned.
        self.E_off = ((k_dim + 7) // 8) * 8
        w_cat = jnp.zeros((self.E_off + c_dim, c_in), jnp.float32)
        w_cat = w_cat.at[:k_dim].set(self.kp_w).at[self.E_off:].set(self.enc_w)
        b_cat = jnp.zeros((self.E_off + c_dim, 1), jnp.float32)
        b_cat = b_cat.at[:k_dim].set(self.kp_b).at[self.E_off:].set(self.enc_b)
        self.w_cat = w_cat
        self.b_cat = b_cat
        # precomputed normalized voxel-center coordinates for the flattened
        # (Z*H*W) axis: (3,S) rows = (x,y,z) for heat maps, (S,3) for kp means.
        zc = jnp.linspace(-1.0, 1.0, Z)
        yc = jnp.linspace(-1.0, 1.0, H)
        xc = jnp.linspace(-1.0, 1.0, W)
        Zg, Yg, Xg = jnp.meshgrid(zc, yc, xc, indexing='ij')
        self.coords_3s = jnp.stack(
            [Xg.reshape(-1), Yg.reshape(-1), Zg.reshape(-1)], axis=0)  # (3, S)
        self.coords_s3 = jnp.transpose(self.coords_3s)                 # (S, 3)

    # nearest-voxel linear index (shared by kernel path and reference) -------
    def _linear_indices(self, p):
        Z, H, W = self.reso_grid
        ix = jnp.clip(jnp.round((p[..., 0] + 1.0) * 0.5 * (W - 1)), 0, W - 1)
        iy = jnp.clip(jnp.round((p[..., 1] + 1.0) * 0.5 * (H - 1)), 0, H - 1)
        iz = jnp.clip(jnp.round((p[..., 2] + 1.0) * 0.5 * (Z - 1)), 0, Z - 1)
        return (iz.astype(jnp.int32) * (H * W)
                + iy.astype(jnp.int32) * W + ix.astype(jnp.int32))     # (N, T)

    # pallas_call wrappers ----------------------------------------------------
    def _kps_only_call(self, x, Gn):
        N, Cin, GS = x.shape
        K = self.kp_w.shape[0]
        S = self.S
        kern = functools.partial(_kps_only_kernel, Gn=Gn, K=K, S=S)
        return pl.pallas_call(
            kern,
            out_shape=jax.ShapeDtypeStruct((N, Gn, K, 3), jnp.float32),
            grid=(N,),
            in_specs=[
                pl.BlockSpec((1, Cin, GS), lambda n: (n, 0, 0)),
                pl.BlockSpec((K, Cin), lambda n: (0, 0)),
                pl.BlockSpec((K, 1), lambda n: (0, 0)),
                pl.BlockSpec((S, 3), lambda n: (0, 0)),
            ],
            out_specs=pl.BlockSpec((1, Gn, K, 3), lambda n: (n, 0, 0, 0)),
            compiler_params=pltpu.CompilerParams(
                dimension_semantics=("parallel",)),
        )(x, self.kp_w, self.kp_b, self.coords_s3)

    def _fused_call(self, x, Gn, idx, pT):
        N, Cin, GS = x.shape
        S = self.S
        K = self.kp_w.shape[0]
        D = self.enc_w.shape[0]
        E_off = self.E_off
        R = E_off + D
        Tpad = idx.shape[-1]
        Hd, Din = self.dec_w1.shape
        # TODO(synk): per-object std dict (std == -1 config) not modeled;
        #             scalar std used.
        inv_std2 = float((1.0 / self.std) ** 2)
        kern = functools.partial(_fused_kernel, Gn=Gn, K=K, D=D, E_off=E_off,
                                 S=S, Tpad=Tpad, inv_std2=inv_std2)
        flops = N * (2 * R * Cin * Gn * S            # combined pointwise conv
                     + Gn * 2 * K * S * 3            # keypoint-mean matmuls
                     + 2 * 2 * D * S * Tpad          # one-hot gathers
                     + 2 * Hd * Din * 2 * Tpad       # MLP layer 1
                     + 2 * Hd * 2 * Tpad             # MLP layer 2
                     + 12 * K * S)                   # heat maps + coefficients
        transcendentals = N * (Gn * K * S + 2 * K * S + 2 * Tpad)
        bytes_accessed = 4 * (x.size + idx.size + pT.size
                              + self.w_cat.size + self.b_cat.size
                              + self.coords_s3.size + self.coords_3s.size
                              + self.dec_w1.size + self.dec_b1.size
                              + self.dec_w2.size + self.dec_b2.size
                              + N * Gn * K * 3 + N * 2 * Tpad)
        cost = pl.CostEstimate(flops=flops, transcendentals=transcendentals,
                               bytes_accessed=bytes_accessed)
        return pl.pallas_call(
            kern,
            out_shape=(jax.ShapeDtypeStruct((N, Gn, K, 3), jnp.float32),
                       jax.ShapeDtypeStruct((N, 1, 2 * Tpad), jnp.float32)),
            grid=(N,),
            in_specs=[
                pl.BlockSpec((1, Cin, GS), lambda n: (n, 0, 0)),
                pl.BlockSpec((R, Cin), lambda n: (0, 0)),
                pl.BlockSpec((R, 1), lambda n: (0, 0)),
                pl.BlockSpec((S, 3), lambda n: (0, 0)),
                pl.BlockSpec((3, S), lambda n: (0, 0)),
                pl.BlockSpec((1, 1, Tpad), lambda n: (n, 0, 0)),
                pl.BlockSpec((1, 3, Tpad), lambda n: (n, 0, 0)),
                pl.BlockSpec((Hd, Din), lambda n: (0, 0)),
                pl.BlockSpec((Hd, 1), lambda n: (0, 0)),
                pl.BlockSpec((1, Hd), lambda n: (0, 0)),
                pl.BlockSpec((1, 1), lambda n: (0, 0)),
            ],
            out_specs=(pl.BlockSpec((1, Gn, K, 3), lambda n: (n, 0, 0, 0)),
                       pl.BlockSpec((1, 1, 2 * Tpad), lambda n: (n, 0, 0))),
            compiler_params=pltpu.CompilerParams(
                dimension_semantics=("parallel",),
                vmem_limit_bytes=32 * 1024 * 1024),
            cost_estimate=cost,
        )(x, self.w_cat, self.b_cat, self.coords_s3, self.coords_3s, idx, pT,
          self.dec_w1, self.dec_b1, self.dec_w2, self.dec_b2)

    # forward -----------------------------------------------------------------
    def forward(self, inputs1, inputs2, inputs3=None, p=None, obj_name='Laptop'):
        outputs = {}
        N = inputs1.shape[0]
        grids = [inputs1, inputs2] + ([inputs3] if inputs3 is not None else [])
        Gn = len(grids)
        # (N, Cin, Gn*S): the grids of one batch item are contiguous on the
        # lane axis so each grid step does one lane-dense matmul for all heads.
        x = jnp.stack([g.reshape(N, -1, self.S) for g in grids], axis=2)
        x = x.reshape(N, -1, Gn * self.S)
        if p is None:
            kps = self._kps_only_call(x, Gn)                       # (N, Gn, K, 3)
        else:
            T = p.shape[1]
            Tpad = -(-T // 128) * 128                              # lane-align
            lin = self._linear_indices(p)                          # (N, T) int32
            idx = jnp.zeros((N, 1, Tpad), jnp.int32).at[:, 0, :T].set(lin)
            pT = jnp.zeros((N, 3, Tpad), jnp.float32)
            pT = pT.at[:, :, :T].set(jnp.transpose(p, (0, 2, 1)))
            kps, occ = self._fused_call(x, Gn, idx, pT)
            occ = occ.reshape(N, 2 * Tpad)
            # TODO(synk): dist.Bernoulli(logits=...) branch (sigmoid=False) has
            #             no Pallas analogue; probabilities are returned.
            outputs['occ_transp'] = occ[:, :T]
            outputs['occ_ori'] = occ[:, Tpad:Tpad + T]
        outputs['kps1'] = kps[:, 0]
        outputs['kps2'] = kps[:, 1]
        if inputs3 is not None:
            # kp_encoder(inputs2, inputs3) would recompute kps2 identically.
            outputs['kps2_'] = kps[:, 1]
            outputs['kps3'] = kps[:, 2]
        return outputs


# ----------------------------------------------------------------------------
# Pure-JAX reference (mirrors the PyTorch code path) for a sanity check.
# ----------------------------------------------------------------------------
def _ref_forward(model, inputs1, inputs2, inputs3, p):
    def conv(x, w, b):
        N, C, Z, H, W = x.shape
        y = jnp.einsum('oc,ncs->nos', w, x.reshape(N, C, -1)) + b[None]
        return y.reshape(N, w.shape[0], Z, H, W)

    def sp_softmax(f):
        sh = f.shape
        return jax.nn.softmax(f.reshape(sh[:2] + (-1,)), axis=-1).reshape(sh)

    def kp_mean(f):
        N, K, Z, H, W = f.shape
        S_z = f.sum(-1).sum(-1)
        S_y = f.sum(-1).sum(-2)
        S_x = f.sum(-2).sum(-2)
        u_z = (S_z * jnp.linspace(-1.0, 1.0, Z)).sum(-1)
        u_y = (S_y * jnp.linspace(-1.0, 1.0, H)).sum(-1)
        u_x = (S_x * jnp.linspace(-1.0, 1.0, W)).sum(-1)
        return jnp.stack((u_x, u_y, u_z), -1)

    def gauss(reso, mu, std):
        Z, H, W = reso
        mu_x = mu[:, :, 0][..., None, None, None]
        mu_y = mu[:, :, 1][..., None, None, None]
        mu_z = mu[:, :, 2][..., None, None, None]
        z = jnp.linspace(-1.0, 1.0, Z).reshape(1, 1, Z, 1, 1)
        y = jnp.linspace(-1.0, 1.0, H).reshape(1, 1, 1, H, 1)
        x = jnp.linspace(-1.0, 1.0, W).reshape(1, 1, 1, 1, W)
        d = ((x - mu_x) ** 2 + (y - mu_y) ** 2 + (z - mu_z) ** 2) * (1.0 / std) ** 2
        return jnp.exp(-d)

    def transport(s_kp, t_kp, c1, c2):
        out = c1
        for k in range(s_kp.shape[1]):
            s = s_kp[:, k][:, None]
            t = t_kp[:, k][:, None]
            out = (1.0 - s) * (1.0 - t) * out + t * c2
        return out

    def sample(c_grid, pp):
        N, D, Z, H, W = c_grid.shape
        T = pp.shape[1]
        lin = model._linear_indices(pp)
        c_flat = c_grid.reshape(N, D, -1)
        idx = jnp.broadcast_to(lin[:, None, :], (N, D, T))
        feat = jnp.take_along_axis(c_flat, idx, axis=2)
        return jnp.transpose(feat, (0, 2, 1))

    def decode(pp, c_grid):
        feat = sample(c_grid, pp)                                    # (N, T, D)
        x = jnp.concatenate([feat, pp], axis=-1)                     # (N, T, Din)
        h = jnp.maximum(jnp.einsum('ntd,hd->nth', x, model.dec_w1)
                        + model.dec_b1[:, 0][None, None, :], 0.0)
        logit = jnp.einsum('nth,oh->nto', h, model.dec_w2) + model.dec_b2[0, 0]
        return jax.nn.sigmoid(logit[..., 0])

    out = {}
    g1 = conv(inputs1, model.kp_w, model.kp_b)
    g2 = conv(inputs2, model.kp_w, model.kp_b)
    g3 = conv(inputs3, model.kp_w, model.kp_b)
    out['kps1'] = kp_mean(sp_softmax(g1))
    out['kps2'] = kp_mean(sp_softmax(g2))
    out['kps2_'] = out['kps2']
    out['kps3'] = kp_mean(sp_softmax(g3))
    c1 = conv(inputs1, model.enc_w, model.enc_b)
    c2 = conv(inputs2, model.enc_w, model.enc_b)
    h1 = gauss(model.reso_grid, out['kps1'], model.std)
    h2 = gauss(model.reso_grid, out['kps2'], model.std)
    c12 = transport(h1, h2, c1, c2)
    out['occ_transp'] = decode(p, c12)
    out['occ_ori'] = decode(p, c2)
    return out


if __name__ == "__main__":
    key = jax.random.PRNGKey(0)
    N, Cin, Z, H, W = 2, 4, 8, 8, 8
    K, D, T = 4, 8, 64
    k1, k2, k3, k4 = jax.random.split(key, 4)
    inputs1 = jax.random.normal(k1, (N, Cin, Z, H, W), jnp.float32)
    inputs2 = jax.random.normal(k2, (N, Cin, Z, H, W), jnp.float32)
    inputs3 = jax.random.normal(k3, (N, Cin, Z, H, W), jnp.float32)
    p = jax.random.uniform(k4, (N, T, 3), jnp.float32, minval=-1.0, maxval=1.0)

    model = TransporterPallas(c_in=Cin, c_dim=D, k_dim=K, reso_grid=(Z, H, W),
                              std=0.2, hidden=32, sigmoid=True,
                              key=jax.random.PRNGKey(42))

    fwd = jax.jit(model.forward)
    outputs = jax.block_until_ready(fwd(inputs1, inputs2, inputs3, p))

    # sanity check against pure-JAX reference
    ref = jax.block_until_ready(_ref_forward(model, inputs1, inputs2, inputs3, p))
    for name in ['kps1', 'kps2', 'kps2_', 'kps3', 'occ_transp', 'occ_ori']:
        got = np.asarray(outputs[name])
        exp = np.asarray(ref[name])
        assert got.shape == exp.shape, (name, got.shape, exp.shape)
        assert np.allclose(got, exp, atol=3e-3, rtol=3e-3), (
            name, float(np.max(np.abs(got - exp))))

    print("KERNEL_OK")
</pallas_src>

<mosaic_0001>
module attributes {stable_mosaic.version = 11 : i64} {
  func.func @_fused_kernel(%arg0: i32, %arg1: memref<1x4x1536xf32, #tpu.memory_space<vmem>>, %arg2: memref<16x4xf32, #tpu.memory_space<vmem>>, %arg3: memref<16x1xf32, #tpu.memory_space<vmem>>, %arg4: memref<512x3xf32, #tpu.memory_space<vmem>>, %arg5: memref<3x512xf32, #tpu.memory_space<vmem>>, %arg6: memref<1x1x128xi32, #tpu.memory_space<vmem>>, %arg7: memref<1x3x128xf32, #tpu.memory_space<vmem>>, %arg8: memref<32x11xf32, #tpu.memory_space<vmem>>, %arg9: memref<32x1xf32, #tpu.memory_space<vmem>>, %arg10: memref<1x32xf32, #tpu.memory_space<vmem>>, %arg11: memref<1x1xf32, #tpu.memory_space<vmem>>, %arg12: memref<1x3x4x3xf32, #tpu.memory_space<vmem>>, %arg13: memref<1x1x256xf32, #tpu.memory_space<vmem>>) attributes {dimension_semantics = [#tpu.dimension_semantics<parallel>], iteration_bounds = array<i64: 2>, scalar_prefetch = 0 : i64, scratch_operands = 0 : i64, tpu.core_type = #tpu.core_type<tc>, window_params = [{transform_indices = @transform_0, window_bounds = array<i64: 1, 4, 1536>}, {pipeline_mode = #tpu.pipeline_mode<synchronous>, transform_indices = @transform_1, window_bounds = array<i64: 16, 4>}, {pipeline_mode = #tpu.pipeline_mode<synchronous>, transform_indices = @transform_2, window_bounds = array<i64: 16, 1>}, {pipeline_mode = #tpu.pipeline_mode<synchronous>, transform_indices = @transform_3, window_bounds = array<i64: 512, 3>}, {pipeline_mode = #tpu.pipeline_mode<synchronous>, transform_indices = @transform_4, window_bounds = array<i64: 3, 512>}, {transform_indices = @transform_5, window_bounds = array<i64: 1, 1, 128>}, {transform_indices = @transform_6, window_bounds = array<i64: 1, 3, 128>}, {pipeline_mode = #tpu.pipeline_mode<synchronous>, transform_indices = @transform_7, window_bounds = array<i64: 32, 11>}, {pipeline_mode = #tpu.pipeline_mode<synchronous>, transform_indices = @transform_8, window_bounds = array<i64: 32, 1>}, {pipeline_mode = #tpu.pipeline_mode<synchronous>, transform_indices = @transform_9, window_bounds = array<i64: 1, 32>}, {pipeline_mode = #tpu.pipeline_mode<synchronous>, transform_indices = @transform_10, window_bounds = array<i64: 1, 1>}, {transform_indices = @transform_11, window_bounds = array<i64: 1, 3, 4, 3>}, {transform_indices = @transform_12, window_bounds = array<i64: 1, 1, 256>}]} {
    %c0 = arith.constant 0 : index
    %c0_0 = arith.constant 0 : index
    %c0_1 = arith.constant 0 : index
    %0 = vector.load %arg1[%c0, %c0_0, %c0_1] : memref<1x4x1536xf32, #tpu.memory_space<vmem>>, vector<1x4x1536xf32>
    %1 = vector.shape_cast %0 : vector<1x4x1536xf32> to vector<4x1536xf32>
    %c0_2 = arith.constant 0 : index
    %c0_3 = arith.constant 0 : index
    %2 = vector.load %arg2[%c0_2, %c0_3] : memref<16x4xf32, #tpu.memory_space<vmem>>, vector<16x4xf32>
    %cst = arith.constant dense<0.000000e+00> : vector<16x1536xf32>
    %3 = tpu.matmul %2, %1, %cst {dimension_numbers = #tpu.dot_dimension_numbers<[1], [0], [0], [1], [0, 0, 1, 1], [], []>} : vector<16x4xf32>, vector<4x1536xf32>, vector<16x1536xf32> -> vector<16x1536xf32>
    %c0_4 = arith.constant 0 : index
    %c0_5 = arith.constant 0 : index
    %4 = vector.load %arg3[%c0_4, %c0_5] : memref<16x1xf32, #tpu.memory_space<vmem>>, vector<16x1xf32>
    %5 = vector.broadcast %4 : vector<16x1xf32> to vector<16x1536xf32>
    %6 = arith.addf %3, %5 : vector<16x1536xf32>
    %7 = vector.extract_strided_slice %6 {offsets = [0, 0], sizes = [4, 1536], strides = [1, 1]} : vector<16x1536xf32> to vector<4x1536xf32>
    %8 = vector.extract_strided_slice %7 {offsets = [0, 0], sizes = [4, 512], strides = [1, 1]} : vector<4x1536xf32> to vector<4x512xf32>
    %cst_6 = arith.constant dense<0xFF800000> : vector<4xf32>
    %9 = vector.multi_reduction <maximumf>, %8, %cst_6 [1] : vector<4x512xf32> to vector<4xf32>
    %10 = vector.shape_cast %9 : vector<4xf32> to vector<4x1xf32>
    %11 = vector.broadcast %10 : vector<4x1xf32> to vector<4x512xf32>
    %12 = arith.subf %8, %11 : vector<4x512xf32>
    %13 = math.exp %12 : vector<4x512xf32>
    %cst_7 = arith.constant dense<0.000000e+00> : vector<4xf32>
    %14 = vector.multi_reduction <add>, %13, %cst_7 [1] : vector<4x512xf32> to vector<4xf32>
    %15 = vector.shape_cast %14 : vector<4xf32> to vector<4x1xf32>
    %c0_8 = arith.constant 0 : index
    %c0_9 = arith.constant 0 : index
    %16 = vector.load %arg4[%c0_8, %c0_9] : memref<512x3xf32, #tpu.memory_space<vmem>>, vector<512x3xf32>
    %cst_10 = arith.constant dense<0.000000e+00> : vector<4x3xf32>
    %17 = tpu.matmul %13, %16, %cst_10 {dimension_numbers = #tpu.dot_dimension_numbers<[1], [0], [0], [1], [0, 0, 1, 1], [], []>} : vector<4x512xf32>, vector<512x3xf32>, vector<4x3xf32> -> vector<4x3xf32>
    %18 = vector.broadcast %15 : vector<4x1xf32> to vector<4x3xf32>
    %19 = arith.divf %17, %18 : vector<4x3xf32>
    %c0_11 = arith.constant 0 : index
    %c0_12 = arith.constant 0 : index
    %c0_13 = arith.constant 0 : index
    %c0_14 = arith.constant 0 : index
    %20 = vector.load %arg12[%c0_11, %c0_12, %c0_13, %c0_14] : memref<1x3x4x3xf32, #tpu.memory_space<vmem>>, vector<1x1x4x3xf32>
    %21 = vector.shape_cast %20 : vector<1x1x4x3xf32> to vector<4x3xf32>
    %22 = vector.shape_cast %19 : vector<4x3xf32> to vector<1x1x4x3xf32>
    tpu.vector_store %arg12[%c0_11, %c0_12, %c0_13, %c0_14], %22 {strides = array<i32>} : memref<1x3x4x3xf32, #tpu.memory_space<vmem>>, vector<1x1x4x3xf32>,
    %23 = vector.extract_strided_slice %7 {offsets = [0, 512], sizes = [4, 512], strides = [1, 1]} : vector<4x1536xf32> to vector<4x512xf32>
    %cst_15 = arith.constant dense<0xFF800000> : vector<4xf32>
    %24 = vector.multi_reduction <maximumf>, %23, %cst_15 [1] : vector<4x512xf32> to vector<4xf32>
    %25 = vector.shape_cast %24 : vector<4xf32> to vector<4x1xf32>
    %26 = vector.broadcast %25 : vector<4x1xf32> to vector<4x512xf32>
    %27 = arith.subf %23, %26 : vector<4x512xf32>
    %28 = math.exp %27 : vector<4x512xf32>
    %cst_16 = arith.constant dense<0.000000e+00> : vector<4xf32>
    %29 = vector.multi_reduction <add>, %28, %cst_16 [1] : vector<4x512xf32> to vector<4xf32>
    %30 = vector.shape_cast %29 : vector<4xf32> to vector<4x1xf32>
    %c0_17 = arith.constant 0 : index
    %c0_18 = arith.constant 0 : index
    %31 = vector.load %arg4[%c0_17, %c0_18] : memref<512x3xf32, #tpu.memory_space<vmem>>, vector<512x3xf32>
    %cst_19 = arith.constant dense<0.000000e+00> : vector<4x3xf32>
    %32 = tpu.matmul %28, %31, %cst_19 {dimension_numbers = #tpu.dot_dimension_numbers<[1], [0], [0], [1], [0, 0, 1, 1], [], []>} : vector<4x512xf32>, vector<512x3xf32>, vector<4x3xf32> -> vector<4x3xf32>
    %33 = vector.broadcast %30 : vector<4x1xf32> to vector<4x3xf32>
    %34 = arith.divf %32, %33 : vector<4x3xf32>
    %c0_20 = arith.constant 0 : index
    %c1 = arith.constant 1 : index
    %c0_21 = arith.constant 0 : index
    %c0_22 = arith.constant 0 : index
    %35 = vector.load %arg12[%c0_20, %c1, %c0_21, %c0_22] : memref<1x3x4x3xf32, #tpu.memory_space<vmem>>, vector<1x1x4x3xf32>
    %36 = vector.shape_cast %35 : vector<1x1x4x3xf32> to vector<4x3xf32>
    %37 = vector.shape_cast %34 : vector<4x3xf32> to vector<1x1x4x3xf32>
    tpu.vector_store %arg12[%c0_20, %c1, %c0_21, %c0_22], %37 {strides = array<i32>} : memref<1x3x4x3xf32, #tpu.memory_space<vmem>>, vector<1x1x4x3xf32>,
    %38 = vector.extract_strided_slice %7 {offsets = [0, 1024], sizes = [4, 512], strides = [1, 1]} : vector<4x1536xf32> to vector<4x512xf32>
    %cst_23 = arith.constant dense<0xFF800000> : vector<4xf32>
    %39 = vector.multi_reduction <maximumf>, %38, %cst_23 [1] : vector<4x512xf32> to vector<4xf32>
    %40 = vector.shape_cast %39 : vector<4xf32> to vector<4x1xf32>
    %41 = vector.broadcast %40 : vector<4x1xf32> to vector<4x512xf32>
    %42 = arith.subf %38, %41 : vector<4x512xf32>
    %43 = math.exp %42 : vector<4x512xf32>
    %cst_24 = arith.constant dense<0.000000e+00> : vector<4xf32>
    %44 = vector.multi_reduction <add>, %43, %cst_24 [1] : vector<4x512xf32> to vector<4xf32>
    %45 = vector.shape_cast %44 : vector<4xf32> to vector<4x1xf32>
    %c0_25 = arith.constant 0 : index
    %c0_26 = arith.constant 0 : index
    %46 = vector.load %arg4[%c0_25, %c0_26] : memref<512x3xf32, #tpu.memory_space<vmem>>, vector<512x3xf32>
    %cst_27 = arith.constant dense<0.000000e+00> : vector<4x3xf32>
    %47 = tpu.matmul %43, %46, %cst_27 {dimension_numbers = #tpu.dot_dimension_numbers<[1], [0], [0], [1], [0, 0, 1, 1], [], []>} : vector<4x512xf32>, vector<512x3xf32>, vector<4x3xf32> -> vector<4x3xf32>
    %48 = vector.broadcast %45 : vector<4x1xf32> to vector<4x3xf32>
    %49 = arith.divf %47, %48 : vector<4x3xf32>
    %c0_28 = arith.constant 0 : index
    %c2 = arith.constant 2 : index
    %c0_29 = arith.constant 0 : index
    %c0_30 = arith.constant 0 : index
    %50 = vector.load %arg12[%c0_28, %c2, %c0_29, %c0_30] : memref<1x3x4x3xf32, #tpu.memory_space<vmem>>, vector<1x1x4x3xf32>
    %51 = vector.shape_cast %50 : vector<1x1x4x3xf32> to vector<4x3xf32>
    %52 = vector.shape_cast %49 : vector<4x3xf32> to vector<1x1x4x3xf32>
    tpu.vector_store %arg12[%c0_28, %c2, %c0_29, %c0_30], %52 {strides = array<i32>} : memref<1x3x4x3xf32, #tpu.memory_space<vmem>>, vector<1x1x4x3xf32>,
    %53 = vector.extract_strided_slice %6 {offsets = [8, 0], sizes = [8, 512], strides = [1, 1]} : vector<16x1536xf32> to vector<8x512xf32>
    %54 = vector.extract_strided_slice %6 {offsets = [8, 512], sizes = [8, 512], strides = [1, 1]} : vector<16x1536xf32> to vector<8x512xf32>
    %c0_31 = arith.constant 0 : index
    %c0_32 = arith.constant 0 : index
    %55 = vector.load %arg5[%c0_31, %c0_32] : memref<3x512xf32, #tpu.memory_space<vmem>>, vector<1x512xf32>
    %c1_33 = arith.constant 1 : index
    %c0_34 = arith.constant 0 : index
    %56 = vector.load %arg5[%c1_33, %c0_34] : memref<3x512xf32, #tpu.memory_space<vmem>>, vector<1x512xf32>
    %c2_35 = arith.constant 2 : index
    %c0_36 = arith.constant 0 : index
    %57 = vector.load %arg5[%c2_35, %c0_36] : memref<3x512xf32, #tpu.memory_space<vmem>>, vector<1x512xf32>
    %58 = vector.extract_strided_slice %19 {offsets = [0, 0], sizes = [4, 1], strides = [1, 1]} : vector<4x3xf32> to vector<4x1xf32>
    %59 = vector.extract_strided_slice %19 {offsets = [0, 1], sizes = [4, 1], strides = [1, 1]} : vector<4x3xf32> to vector<4x1xf32>
    %60 = vector.extract_strided_slice %19 {offsets = [0, 2], sizes = [4, 1], strides = [1, 1]} : vector<4x3xf32> to vector<4x1xf32>
    %61 = vector.broadcast %55 : vector<1x512xf32> to vector<4x512xf32>
    %62 = vector.broadcast %58 : vector<4x1xf32> to vector<4x512xf32>
    %63 = arith.subf %61, %62 : vector<4x512xf32>
    %64 = arith.mulf %63, %63 : vector<4x512xf32>
    %65 = vector.broadcast %56 : vector<1x512xf32> to vector<4x512xf32>
    %66 = vector.broadcast %59 : vector<4x1xf32> to vector<4x512xf32>
    %67 = arith.subf %65, %66 : vector<4x512xf32>
    %68 = arith.mulf %67, %67 : vector<4x512xf32>
    %69 = arith.addf %64, %68 : vector<4x512xf32>
    %70 = vector.broadcast %57 : vector<1x512xf32> to vector<4x512xf32>
    %71 = vector.broadcast %60 : vector<4x1xf32> to vector<4x512xf32>
    %72 = arith.subf %70, %71 : vector<4x512xf32>
    %73 = arith.mulf %72, %72 : vector<4x512xf32>
    %74 = arith.addf %69, %73 : vector<4x512xf32>
    %cst_37 = arith.constant 0.000000e+00 : f32
    %75 = vector.broadcast %cst_37 : f32 to vector<4x512xf32>
    %76 = arith.subf %75, %74 : vector<4x512xf32>
    %cst_38 = arith.constant 2.500000e+01 : f32
    %77 = vector.broadcast %cst_38 : f32 to vector<4x512xf32>
    %78 = arith.mulf %76, %77 : vector<4x512xf32>
    %79 = math.exp %78 : vector<4x512xf32>
    %80 = vector.extract_strided_slice %34 {offsets = [0, 0], sizes = [4, 1], strides = [1, 1]} : vector<4x3xf32> to vector<4x1xf32>
    %81 = vector.extract_strided_slice %34 {offsets = [0, 1], sizes = [4, 1], strides = [1, 1]} : vector<4x3xf32> to vector<4x1xf32>
    %82 = vector.extract_strided_slice %34 {offsets = [0, 2], sizes = [4, 1], strides = [1, 1]} : vector<4x3xf32> to vector<4x1xf32>
    %83 = vector.broadcast %55 : vector<1x512xf32> to vector<4x512xf32>
    %84 = vector.broadcast %80 : vector<4x1xf32> to vector<4x512xf32>
    %85 = arith.subf %83, %84 : vector<4x512xf32>
    %86 = arith.mulf %85, %85 : vector<4x512xf32>
    %87 = vector.broadcast %56 : vector<1x512xf32> to vector<4x512xf32>
    %88 = vector.broadcast %81 : vector<4x1xf32> to vector<4x512xf32>
    %89 = arith.subf %87, %88 : vector<4x512xf32>
    %90 = arith.mulf %89, %89 : vector<4x512xf32>
    %91 = arith.addf %86, %90 : vector<4x512xf32>
    %92 = vector.broadcast %57 : vector<1x512xf32> to vector<4x512xf32>
    %93 = vector.broadcast %82 : vector<4x1xf32> to vector<4x512xf32>
    %94 = arith.subf %92, %93 : vector<4x512xf32>
    %95 = arith.mulf %94, %94 : vector<4x512xf32>
    %96 = arith.addf %91, %95 : vector<4x512xf32>
    %cst_39 = arith.constant 0.000000e+00 : f32
    %97 = vector.broadcast %cst_39 : f32 to vector<4x512xf32>
    %98 = arith.subf %97, %96 : vector<4x512xf32>
    %cst_40 = arith.constant 2.500000e+01 : f32
    %99 = vector.broadcast %cst_40 : f32 to vector<4x512xf32>
    %100 = arith.mulf %98, %99 : vector<4x512xf32>
    %101 = math.exp %100 : vector<4x512xf32>
    %102 = vector.extract_strided_slice %79 {offsets = [0, 0], sizes = [1, 512], strides = [1, 1]} : vector<4x512xf32> to vector<1x512xf32>
    %cst_41 = arith.constant 1.000000e+00 : f32
    %103 = vector.broadcast %cst_41 : f32 to vector<1x512xf32>
    %104 = arith.subf %103, %102 : vector<1x512xf32>
    %105 = vector.extract_strided_slice %101 {offsets = [0, 0], sizes = [1, 512], strides = [1, 1]} : vector<4x512xf32> to vector<1x512xf32>
    %cst_42 = arith.constant 1.000000e+00 : f32
    %106 = vector.broadcast %cst_42 : f32 to vector<1x512xf32>
    %107 = arith.subf %106, %105 : vector<1x512xf32>
    %108 = arith.mulf %104, %107 : vector<1x512xf32>
    %109 = vector.extract_strided_slice %101 {offsets = [0, 0], sizes = [1, 512], strides = [1, 1]} : vector<4x512xf32> to vector<1x512xf32>
    %110 = vector.extract_strided_slice %79 {offsets = [1, 0], sizes = [1, 512], strides = [1, 1]} : vector<4x512xf32> to vector<1x512xf32>
    %cst_43 = arith.constant 1.000000e+00 : f32
    %111 = vector.broadcast %cst_43 : f32 to vector<1x512xf32>
    %112 = arith.subf %111, %110 : vector<1x512xf32>
    %113 = vector.extract_strided_slice %101 {offsets = [1, 0], sizes = [1, 512], strides = [1, 1]} : vector<4x512xf32> to vector<1x512xf32>
    %cst_44 = arith.constant 1.000000e+00 : f32
    %114 = vector.broadcast %cst_44 : f32 to vector<1x512xf32>
    %115 = arith.subf %114, %113 : vector<1x512xf32>
    %116 = arith.mulf %112, %115 : vector<1x512xf32>
    %117 = arith.mulf %116, %108 : vector<1x512xf32>
    %118 = arith.mulf %116, %109 : vector<1x512xf32>
    %119 = vector.extract_strided_slice %101 {offsets = [1, 0], sizes = [1, 512], strides = [1, 1]} : vector<4x512xf32> to vector<1x512xf32>
    %120 = arith.addf %118, %119 : vector<1x512xf32>
    %121 = vector.extract_strided_slice %79 {offsets = [2, 0], sizes = [1, 512], strides = [1, 1]} : vector<4x512xf32> to vector<1x512xf32>
    %cst_45 = arith.constant 1.000000e+00 : f32
    %122 = vector.broadcast %cst_45 : f32 to vector<1x512xf32>
    %123 = arith.subf %122, %121 : vector<1x512xf32>
    %124 = vector.extract_strided_slice %101 {offsets = [2, 0], sizes = [1, 512], strides = [1, 1]} : vector<4x512xf32> to vector<1x512xf32>
    %cst_46 = arith.constant 1.000000e+00 : f32
    %125 = vector.broadcast %cst_46 : f32 to vector<1x512xf32>
    %126 = arith.subf %125, %124 : vector<1x512xf32>
    %127 = arith.mulf %123, %126 : vector<1x512xf32>
    %128 = arith.mulf %127, %117 : vector<1x512xf32>
    %129 = arith.mulf %127, %120 : vector<1x512xf32>
    %130 = vector.extract_strided_slice %101 {offsets = [2, 0], sizes = [1, 512], strides = [1, 1]} : vector<4x512xf32> to vector<1x512xf32>
    %131 = arith.addf %129, %130 : vector<1x512xf32>
    %132 = vector.extract_strided_slice %79 {offsets = [3, 0], sizes = [1, 512], strides = [1, 1]} : vector<4x512xf32> to vector<1x512xf32>
    %cst_47 = arith.constant 1.000000e+00 : f32
    %133 = vector.broadcast %cst_47 : f32 to vector<1x512xf32>
    %134 = arith.subf %133, %132 : vector<1x512xf32>
    %135 = vector.extract_strided_slice %101 {offsets = [3, 0], sizes = [1, 512], strides = [1, 1]} : vector<4x512xf32> to vector<1x512xf32>
    %cst_48 = arith.constant 1.000000e+00 : f32
    %136 = vector.broadcast %cst_48 : f32 to vector<1x512xf32>
    %137 = arith.subf %136, %135 : vector<1x512xf32>
    %138 = arith.mulf %134, %137 : vector<1x512xf32>
    %139 = arith.mulf %138, %128 : vector<1x512xf32>
    %140 = arith.mulf %138, %131 : vector<1x512xf32>
    %141 = vector.extract_strided_slice %101 {offsets = [3, 0], sizes = [1, 512], strides = [1, 1]} : vector<4x512xf32> to vector<1x512xf32>
    %142 = arith.addf %140, %141 : vector<1x512xf32>
    %143 = vector.broadcast %139 : vector<1x512xf32> to vector<8x512xf32>
    %144 = arith.mulf %143, %53 : vector<8x512xf32>
    %145 = vector.broadcast %142 : vector<1x512xf32> to vector<8x512xf32>
    %146 = arith.mulf %145, %54 : vector<8x512xf32>
    %147 = arith.addf %144, %146 : vector<8x512xf32>
    %148 = tpu.iota {dimensions = array<i32: 0>} : vector<512x128xi32>
    %c0_49 = arith.constant 0 : index
    %c0_50 = arith.constant 0 : index
    %c0_51 = arith.constant 0 : index
    %149 = vector.load %arg6[%c0_49, %c0_50, %c0_51] : memref<1x1x128xi32, #tpu.memory_space<vmem>>, vector<1x1x128xi32>
    %150 = vector.shape_cast %149 : vector<1x1x128xi32> to vector<1x128xi32>
    %151 = vector.broadcast %150 : vector<1x128xi32> to vector<512x128xi32>
    %152 = arith.cmpi eq, %148, %151 : vector<512x128xi32>
    %153 = arith.extui %152 : vector<512x128xi1> to vector<512x128xi32>
    %154 = arith.sitofp %153 : vector<512x128xi32> to vector<512x128xf32>
    %cst_52 = arith.constant dense<0.000000e+00> : vector<8x128xf32>
    %155 = tpu.matmul %147, %154, %cst_52 {dimension_numbers = #tpu.dot_dimension_numbers<[1], [0], [0], [1], [0, 0, 1, 1], [], []>} : vector<8x512xf32>, vector<512x128xf32>, vector<8x128xf32> -> vector<8x128xf32>
    %cst_53 = arith.constant dense<0.000000e+00> : vector<8x128xf32>
    %156 = tpu.matmul %54, %154, %cst_53 {dimension_numbers = #tpu.dot_dimension_numbers<[1], [0], [0], [1], [0, 0, 1, 1], [], []>} : vector<8x512xf32>, vector<512x128xf32>, vector<8x128xf32> -> vector<8x128xf32>
    %c0_54 = arith.constant 0 : index
    %c0_55 = arith.constant 0 : index
    %c0_56 = arith.constant 0 : index
    %157 = vector.load %arg7[%c0_54, %c0_55, %c0_56] : memref<1x3x128xf32, #tpu.memory_space<vmem>>, vector<1x3x128xf32>
    %158 = vector.shape_cast %157 : vector<1x3x128xf32> to vector<3x128xf32>
    %159 = tpu.concatenate %155, %158 in 0 : vector<8x128xf32>, vector<3x128xf32> -> vector<11x128xf32>
    %160 = tpu.concatenate %156, %158 in 0 : vector<8x128xf32>, vector<3x128xf32> -> vector<11x128xf32>
    %161 = tpu.concatenate %159, %160 in 1 : vector<11x128xf32>, vector<11x128xf32> -> vector<11x256xf32>
    %c0_57 = arith.constant 0 : index
    %c0_58 = arith.constant 0 : index
    %162 = vector.load %arg8[%c0_57, %c0_58] : memref<32x11xf32, #tpu.memory_space<vmem>>, vector<32x11xf32>
    %cst_59 = arith.constant dense<0.000000e+00> : vector<32x256xf32>
    %163 = tpu.matmul %162, %161, %cst_59 {dimension_numbers = #tpu.dot_dimension_numbers<[1], [0], [0], [1], [0, 0, 1, 1], [], []>} : vector<32x11xf32>, vector<11x256xf32>, vector<32x256xf32> -> vector<32x256xf32>
    %c0_60 = arith.constant 0 : index
    %c0_61 = arith.constant 0 : index
    %164 = vector.load %arg9[%c0_60, %c0_61] : memref<32x1xf32, #tpu.memory_space<vmem>>, vector<32x1xf32>
    %165 = vector.broadcast %164 : vector<32x1xf32> to vector<32x256xf32>
    %166 = arith.addf %163, %165 : vector<32x256xf32>
    %cst_62 = arith.constant 0.000000e+00 : f32
    %167 = vector.broadcast %cst_62 : f32 to vector<32x256xf32>
    %168 = arith.maximumf %166, %167 : vector<32x256xf32>
    %c0_63 = arith.constant 0 : index
    %c0_64 = arith.constant 0 : index
    %169 = vector.load %arg10[%c0_63, %c0_64] : memref<1x32xf32, #tpu.memory_space<vmem>>, vector<1x32xf32>
    %cst_65 = arith.constant dense<0.000000e+00> : vector<1x256xf32>
    %170 = tpu.matmul %169, %168, %cst_65 {dimension_numbers = #tpu.dot_dimension_numbers<[1], [0], [0], [1], [0, 0, 1, 1], [], []>} : vector<1x32xf32>, vector<32x256xf32>, vector<1x256xf32> -> vector<1x256xf32>
    %c0_66 = arith.constant 0 : index
    %c0_67 = arith.constant 0 : index
    %171 = vector.load %arg11[%c0_66, %c0_67] : memref<1x1xf32, #tpu.memory_space<vmem>>, vector<1x1xf32>
    %172 = vector.broadcast %171 : vector<1x1xf32> to vector<1x256xf32>
    %173 = arith.addf %170, %172 : vector<1x256xf32>
    %cst_68 = arith.constant 0.000000e+00 : f32
    %174 = vector.broadcast %cst_68 : f32 to vector<1x256xf32>
    %175 = arith.subf %174, %173 : vector<1x256xf32>
    %176 = math.exp %175 : vector<1x256xf32>
    %cst_69 = arith.constant 1.000000e+00 : f32
    %177 = vector.broadcast %cst_69 : f32 to vector<1x256xf32>
    %178 = arith.addf %177, %176 : vector<1x256xf32>
    %cst_70 = arith.constant 1.000000e+00 : f32
    %179 = vector.broadcast %cst_70 : f32 to vector<1x256xf32>
    %180 = arith.divf %179, %178 : vector<1x256xf32>
    %c0_71 = arith.constant 0 : index
    %c0_72 = arith.constant 0 : index
    %c0_73 = arith.constant 0 : index
    %181 = vector.load %arg13[%c0_71, %c0_72, %c0_73] : memref<1x1x256xf32, #tpu.memory_space<vmem>>, vector<1x1x256xf32>
    %182 = vector.shape_cast %181 : vector<1x1x256xf32> to vector<1x256xf32>
    %183 = vector.shape_cast %180 : vector<1x256xf32> to vector<1x1x256xf32>
    tpu.vector_store %arg13[%c0_71, %c0_72, %c0_73], %183 {strides = array<i32>} : memref<1x1x256xf32, #tpu.memory_space<vmem>>, vector<1x1x256xf32>,
    return
  }
  func.func @transform_0(%arg0: i32) -> (i32, i32, i32) {
    %c0_i32 = arith.constant 0 : i32
    %c0_i32_0 = arith.constant 0 : i32
    %c0_i32_1 = arith.constant 0 : i32
    return %arg0, %c0_i32, %c0_i32_0 : i32, i32, i32
  }
  func.func @transform_1(%arg0: i32) -> (i32, i32) {
    %c0_i32 = arith.constant 0 : i32
    %c0_i32_0 = arith.constant 0 : i32
    %c0_i32_1 = arith.constant 0 : i32
    return %c0_i32, %c0_i32_0 : i32, i32
  }
  func.func @transform_2(%arg0: i32) -> (i32, i32) {
    %c0_i32 = arith.constant 0 : i32
    %c0_i32_0 = arith.constant 0 : i32
    %c0_i32_1 = arith.constant 0 : i32
    return %c0_i32, %c0_i32_0 : i32, i32
  }
  func.func @transform_3(%arg0: i32) -> (i32, i32) {
    %c0_i32 = arith.constant 0 : i32
    %c0_i32_0 = arith.constant 0 : i32
    %c0_i32_1 = arith.constant 0 : i32
    return %c0_i32, %c0_i32_0 : i32, i32
  }
  func.func @transform_4(%arg0: i32) -> (i32, i32) {
    %c0_i32 = arith.constant 0 : i32
    %c0_i32_0 = arith.constant 0 : i32
    %c0_i32_1 = arith.constant 0 : i32
    return %c0_i32, %c0_i32_0 : i32, i32
  }
  func.func @transform_5(%arg0: i32) -> (i32, i32, i32) {
    %c0_i32 = arith.constant 0 : i32
    %c0_i32_0 = arith.constant 0 : i32
    %c0_i32_1 = arith.constant 0 : i32
    return %arg0, %c0_i32, %c0_i32_0 : i32, i32, i32
  }
  func.func @transform_6(%arg0: i32) -> (i32, i32, i32) {
    %c0_i32 = arith.constant 0 : i32
    %c0_i32_0 = arith.constant 0 : i32
    %c0_i32_1 = arith.constant 0 : i32
    return %arg0, %c0_i32, %c0_i32_0 : i32, i32, i32
  }
  func.func @transform_7(%arg0: i32) -> (i32, i32) {
    %c0_i32 = arith.constant 0 : i32
    %c0_i32_0 = arith.constant 0 : i32
    %c0_i32_1 = arith.constant 0 : i32
    return %c0_i32, %c0_i32_0 : i32, i32
  }
  func.func @transform_8(%arg0: i32) -> (i32, i32) {
    %c0_i32 = arith.constant 0 : i32
    %c0_i32_0 = arith.constant 0 : i32
    %c0_i32_1 = arith.constant 0 : i32
    return %c0_i32, %c0_i32_0 : i32, i32
  }
  func.func @transform_9(%arg0: i32) -> (i32, i32) {
    %c0_i32 = arith.constant 0 : i32
    %c0_i32_0 = arith.constant 0 : i32
    %c0_i32_1 = arith.constant 0 : i32
    return %c0_i32, %c0_i32_0 : i32, i32
  }
  func.func @transform_10(%arg0: i32) -> (i32, i32) {
    %c0_i32 = arith.constant 0 : i32
    %c0_i32_0 = arith.constant 0 : i32
    %c0_i32_1 = arith.constant 0 : i32
    return %c0_i32, %c0_i32_0 : i32, i32
  }
  func.func @transform_11(%arg0: i32) -> (i32, i32, i32, i32) {
    %c0_i32 = arith.constant 0 : i32
    %c0_i32_0 = arith.constant 0 : i32
    %c0_i32_1 = arith.constant 0 : i32
    %c0_i32_2 = arith.constant 0 : i32
    return %arg0, %c0_i32, %c0_i32_0, %c0_i32_1 : i32, i32, i32, i32
  }
  func.func @transform_12(%arg0: i32) -> (i32, i32, i32) {
    %c0_i32 = arith.constant 0 : i32
    %c0_i32_0 = arith.constant 0 : i32
    %c0_i32_1 = arith.constant 0 : i32
    return %arg0, %c0_i32, %c0_i32_0 : i32, i32, i32
  }
}

</mosaic_0001>

<bundles_post_ra>
// kernel: forward.1
= control target key start
LH: loop header
LB: loop body
LE: loop exit
PB: predicated region body
PF: predicated region fallthrough
CT: control target
= control target key end

     0   :  { %s4053_s23 = smov 0   ;;  %s5207_s0 = inlined_call_operand.vmem [shape: f32[2,4,1536], index: 0, kind: input, shape index: {}]   ;;  %s5208_s1 = inlined_call_operand.vmem [shape: f32[16,4], index: 1, kind: input, shape index: {}]   ;;  %s5209_s2 = inlined_call_operand.vmem [shape: f32[16,1], index: 2, kind: input, shape index: {}]   ;;  %s5210_s3 = inlined_call_operand.vmem [shape: f32[512,3], index: 3, kind: input, shape index: {}]   ;;  %s5211_s4 = inlined_call_operand.vmem [shape: f32[3,512], index: 4, kind: input, shape index: {}]   ;;  %s5212_s5 = inlined_call_operand.vmem [shape: s32[2,1,128], index: 5, kind: input, shape index: {}]   ;;  %s5213_s6 = inlined_call_operand.vmem [shape: f32[2,3,128], index: 6, kind: input, shape index: {}]   ;;  %s5214_s7 = inlined_call_operand.vmem [shape: f32[32,11], index: 7, kind: input, shape index: {}]   ;;  %s5215_s8 = inlined_call_operand.vmem [shape: f32[32,1], index: 8, kind: input, shape index: {}]   ;;  %s5216_s9 = inlined_call_operand.vmem [shape: f32[1,32], index: 9, kind: input, shape index: {}]   ;;  %s5217_s10 = inlined_call_operand.<no memory space> [shape: f32[1,1], index: 10, kind: input, shape index: {}]   ;;  %s5218_s11 = inlined_call_operand.vmem [shape: f32[2,3,4,3], index: 11, kind: output, shape index: {0}]   ;;  %s5219_s12 = inlined_call_operand.vmem [shape: f32[2,1,256], index: 12, kind: output, shape index: {1}]  }
   0x1   :  { %v18_v0 = vstv %s5217_s10 }
   0x2   :  { %19 = vst [vmem:[#allocation2] sm:$0x1] %v18_v0 }
   0x3 LB: > { %s2961_s24 = sadd.s32 4294967295, %s3976_s23   ;;  %p2965_p0 = scmp.ge.s32.totalorder %s3976_s23, 1  ;;  %s3976_s23 = sphi %s4053_s23, %s25_s23  }
   0x4   : > { %p384_p1 = scmp.lt.s32.totalorder %s3976_s23, 3 }
   0x6   : > { %p385_p2 = pnand %p2965_p0, %p384_p1 }
   0x8   : > { %388 = sbr.rel (%p385_p2) target bundleno = 1588 (0x634), region = 64 }
   0xf   : > { %p437_p3 = scmp.lt.s32.totalorder %s2961_s24, 1  ;;  %v5220_v1 = vmov 0.0   ;;  %v466_v2 = vld [vmem:[%s5209_s2] sm:$0xff]  ;;  %v5222_v3 = vmov 0   ;;  %vm497_vm0 = vcmask 1043456   ;;  %vm490_vm1 = vcmask 31744  }
  0x10   : > { %586 = vmatprep.mubr.f32.mxu0 %v5220_v1  ;;  %592 = vmatprep.mubr.f32.mxu1 %v5220_v1  ;;  %v464_v8 = vld [vmem:[%s5208_s1] sm:$0xff]  ;;  %v465_v9 = vld [vmem:[%s5208_s1 + $0x8] sm:$0xff]  ;;  %v1028_v29 = vld [vmem:[%s5210_s3 + $0x90] sm:$0xff]  ;;  %vm5223_vm2 = vcmask 19456  }
  0x11   : > { %s5402_s24 = smov (!%p437_p3, %s2961_s24), 1  ;;  %3903 = vset.pattern.permute.xlu0 %v5222_v3  ;;  %3904 = vset.pattern.permute.xlu1 %v5222_v3  ;;  %v1026_v18 = vld [vmem:[%s5210_s3 + $0x80] sm:$0xff]  ;;  %v1027_v19 = vld [vmem:[%s5210_s3 + $0x88] sm:$0xff]  ;;  %v1029_v31 = vld [vmem:[%s5210_s3 + $0x98] sm:$0xff] }
  0x12   : > { %470 = vperm.xlu0 %3903, %v466_v2   ;;  %s3886_s26 = smul.u32 48, %s5402_s24  ;;  %v1058_v20 = vld [vmem:[%s5210_s3 + $0x180] sm:$0xff]  ;;  %v4125_v21 = vpack.c.bf16 %v1027_v19, %v1026_v18  ;;  %v1059_v22 = vld [vmem:[%s5210_s3 + $0x188] sm:$0xff]  ;;  %v1060_v32 = vld [vmem:[%s5210_s3 + $0x190] sm:$0xff]  ;;  %v4163_v34 = vpack.c.bf16 %v1029_v31, %v1028_v29  ;;  %s444_s22 = scalar_lea.vmem %s5212_s5, %s5402_s24 }
  0x13   : > { %v1010_v23 = vld [vmem:[%s5210_s3] sm:$0xff]  ;;  %v1011_v24 = vld [vmem:[%s5210_s3 + $0x8] sm:$0xff]  ;;  %v4136_v25 = vpack.c.bf16 %v1059_v22, %v1058_v20  ;;  %v1061_v33 = vld [vmem:[%s5210_s3 + $0x198] sm:$0xff]  ;;  %s2969_s30 = sshll.u32 %s5402_s24, 1 }
  0x14   : > { %s441_s29 = scalar_lea.vmem %s5207_s0, %s3886_s26  ;;  %v4138_v26 = vpack.c.bf16 %v1011_v24, %v1010_v23  ;;  %v1042_v27 = vld [vmem:[%s5210_s3 + $0x100] sm:$0xff]  ;;  %v1043_v28 = vld [vmem:[%s5210_s3 + $0x108] sm:$0xff]  ;;  %v4165_v35 = vpack.c.bf16 %v1061_v33, %v1060_v32  ;;  %v1012_v36 = vld [vmem:[%s5210_s3 + $0x10] sm:$0xff]  ;;  %s3887_s26 = smul.u32 12, %s5402_s24 }
  0x15   : > { %v458_v4 = vld [vmem:[%s441_s29] sm:$0xff]  ;;  %v459_v5 = vld [vmem:[%s441_s29 + $0x8] sm:$0xff]  ;;  %v460_v6 = vld [vmem:[%s441_s29 + $0x10] sm:$0xff]  ;;  %v4150_v30 = vpack.c.bf16 %v1043_v28, %v1042_v27 }
  0x16   : > { %v484_v7 = vcombine.high %v458_v4, %v458_v4  ;;  %v485_v10 = vcombine.high %v459_v5, %v459_v5  ;;  %v486_v11 = vcombine.high %v460_v6, %v460_v6  ;;  %v461_v12 = vld [vmem:[%s441_s29 + $0x18] sm:$0xff]  ;;  %v462_v13 = vld [vmem:[%s441_s29 + $0x20] sm:$0xff]  ;;  %v463_v16 = vld [vmem:[%s441_s29 + $0x28] sm:$0xff]  ;;  %s4588_s29 = scalar_lea.vmem %s5218_s11, %s3887_s26 }
  0x17   : > { %v487_v14 = vcombine.high %v461_v12, %v461_v12  ;;  %v488_v15 = vcombine.high %v462_v13, %v462_v13  ;;  %v489_v17 = vcombine.high %v463_v16, %v463_v16  ;;  %v1013_v37 = vld [vmem:[%s5210_s3 + $0x18] sm:$0xff]  ;;  %v1044_v38 = vld [vmem:[%s5210_s3 + $0x110] sm:$0xff]  ;;  %v1030_v41 = vld [vmem:[%s5210_s3 + $0xa0] sm:$0xff] }
  0x18   : > { %2970 = vmatprep.subr.msk.mxu0 %vm497_vm0, %v484_v7  ;;  %3884 = vmatprep.subr.msk.mxu1 %vm497_vm0, %v484_v7  ;;  %v4177_v39 = vpack.c.bf16 %v1013_v37, %v1012_v36  ;;  %v1045_v40 = vld [vmem:[%s5210_s3 + $0x118] sm:$0xff]  ;;  %v1031_v42 = vld [vmem:[%s5210_s3 + $0xa8] sm:$0xff]  ;;  %v1062_v45 = vld [vmem:[%s5210_s3 + $0x1a0] sm:$0xff] }
  0x19   : > { %2971 = vmatpush1.msk.msra.mxu0 %vm497_vm0, %v458_v4  ;;  %3885 = vmatpush1.msk.msra.mxu1 %vm497_vm0, %v458_v4  ;;  %v4190_v43 = vpack.c.bf16 %v1045_v40, %v1044_v38  ;;  %v4192_v44 = vpack.c.bf16 %v1031_v42, %v1030_v41  ;;  %v1063_v46 = vld [vmem:[%s5210_s3 + $0x1a8] sm:$0xff]  ;;  %v1014_v47 = vld [vmem:[%s5210_s3 + $0x20] sm:$0xff]  ;;  %v1032_v53 = vld [vmem:[%s5210_s3 + $0xb0] sm:$0xff] }
  0x1a   : > { %2972 = vmatmul.mubr.msk.f32.vlgmr.msra.gmra.mrb[0].mxu0 %vm490_vm1, %v464_v8  ;;  %2973 = vmatmul.mubr.msk.f32.vlgmr.msra.gmra.mrb[0].mxu1 %vm490_vm1, %v465_v9  ;;  %v4203_v48 = vpack.c.bf16 %v1063_v46, %v1062_v45  ;;  %v1015_v49 = vld [vmem:[%s5210_s3 + $0x28] sm:$0xff]  ;;  %v1046_v50 = vld [vmem:[%s5210_s3 + $0x120] sm:$0xff]  ;;  %v1033_v54 = vld [vmem:[%s5210_s3 + $0xb8] sm:$0xff] }
  0x1b   : > { %2974 = vmatprep.subr.msk.mxu1 %vm497_vm0, %v485_v10  ;;  %2978 = vmatprep.subr.msk.mxu0 %vm497_vm0, %v486_v11  ;;  %v1047_v51 = vld [vmem:[%s5210_s3 + $0x128] sm:$0xff]  ;;  %v4215_v52 = vpack.c.bf16 %v1015_v49, %v1014_v47  ;;  %v1064_v55 = vld [vmem:[%s5210_s3 + $0x1b0] sm:$0xff]  ;;  %v4230_v57 = vpack.c.bf16 %v1033_v54, %v1032_v53  ;;  %v1065_v58 = vld [vmem:[%s5210_s3 + $0x1b8] sm:$0xff] }
  0x1c   : > { %2975 = vmatpush1.msk.msra.mxu1 %vm497_vm0, %v459_v5  ;;  %663 = vmatprep.mubr.f32.mxu1 %v5220_v1  ;;  %v4228_v56 = vpack.c.bf16 %v1047_v51, %v1046_v50  ;;  %v1016_v59 = vld [vmem:[%s5210_s3 + $0x30] sm:$0xff]  ;;  %v1017_v60 = vld [vmem:[%s5210_s3 + $0x38] sm:$0xff]  ;;  %v4242_v61 = vpack.c.bf16 %v1065_v58, %v1064_v55  ;;  %v1034_v0 = vld [vmem:[%s5210_s3 + $0xc0] sm:$0xff] }
  0x1d   : > { %2979 = vmatpush1.msk.msra.mxu0 %vm497_vm0, %v460_v6  ;;  %740 = vmatprep.mubr.f32.mxu0 %v5220_v1  ;;  %v1048_v62 = vld [vmem:[%s5210_s3 + $0x130] sm:$0xff]  ;;  %v1049_v63 = vld [vmem:[%s5210_s3 + $0x138] sm:$0xff]  ;;  %v1035_v2 = vld [vmem:[%s5210_s3 + $0xc8] sm:$0xff]  ;;  %v4263_v6 = vpack.c.bf16 %v1017_v60, %v1016_v59 }
  0x1e   : > { %2976 = vmatmul.mubr.msk.f32.vlgmr.msra.gmra.mrb[2].mxu1 %vm490_vm1, %v464_v8  ;;  %2980 = vmatmul.mubr.msk.f32.vlgmr.msra.gmra.mrb[2].mxu0 %vm490_vm1, %v464_v8  ;;  %v1066_v4 = vld [vmem:[%s5210_s3 + $0x1c0] sm:$0xff]  ;;  %v1067_v5 = vld [vmem:[%s5210_s3 + $0x1c8] sm:$0xff]  ;;  %v4267_v7 = vpack.c.bf16 %v1049_v63, %v1048_v62 }
  0x1f   : > { %669 = vmatprep.mubr.f32.mxu1 %v5220_v1  ;;  %746 = vmatprep.mubr.f32.mxu0 %v5220_v1 }
  0x20   : > { %2982 = vmatprep.subr.msk.mxu1 %vm497_vm0, %v487_v14  ;;  %2986 = vmatprep.subr.msk.mxu0 %vm497_vm0, %v488_v15 }
  0x21   : > { %2983 = vmatpush1.msk.msra.mxu1 %vm497_vm0, %v461_v12  ;;  %2987 = vmatpush1.msk.msra.mxu0 %vm497_vm0, %v462_v13 }
  0x22   : > { %2977 = vmatmul.mubr.msk.f32.gmra.mrb[4].mxu1 %vm490_vm1, %v465_v9  ;;  %2981 = vmatmul.mubr.msk.f32.gmra.mrb[4].mxu0 %vm490_vm1, %v465_v9 }
  0x23   : > { %817 = vmatprep.mubr.f32.mxu1 %v5220_v1  ;;  %894 = vmatprep.mubr.f32.mxu0 %v5220_v1 }
  0x24   : > { %2990 = vmatprep.subr.msk.mxu1 %vm497_vm0, %v489_v17  ;;  %3551 = vmatprep.subr.bf16.mxu0 %v4125_v21 }
  0x26   : > { %2984 = vmatmul.mubr.msk.f32.vlgmr.msra.gmra.mrb[6].mxu1 %vm490_vm1, %v464_v8  ;;  %2988 = vmatmul.mubr.msk.f32.vlgmr.msra.gmra.mrb[6].mxu0 %vm490_vm1, %v464_v8 }
  0x27   : > { %823 = vmatprep.mubr.f32.mxu1 %v5220_v1  ;;  %2991 = vmatpush1.msk.msra.mxu1 %vm497_vm0, %v463_v16 }
  0x28   : > { %900 = vmatprep.mubr.f32.mxu0 %v5220_v1  ;;  %3583 = vmatprep.subr.bf16.mxu1 %v4136_v25 }
  0x29   : > { %3553 = vmatpush3.bf16.msra.mxu0 %v4138_v26 }
  0x2a   : > { %2985 = vmatmul.mubr.msk.f32.gmra.mrb[8].mxu1 %vm490_vm1, %v465_v9  ;;  %2989 = vmatmul.mubr.msk.f32.gmra.mrb[8].mxu0 %vm490_vm1, %v465_v9 }
  0x2b   : > { %969 = vmatprep.mubr.f32.mxu1 %v5220_v1  ;;  %3555 = vmatprep.subr.bf16.mxu0 %v4163_v34 }
  0x2d   : > { %3557 = vmatpush3.bf16.msra.mxu0 %v4177_v39 }
  0x2e   : > { %2992 = vmatmul.mubr.msk.f32.vlgmr.msra.gmra.mrb[10].mxu1 %vm490_vm1, %v464_v8  ;;  %3559 = vmatprep.subr.bf16.mxu0 %v4192_v44  ;;  %v4269_v8 = vpack.c.bf16 %v1035_v2, %v1034_v0 }
  0x2f   : > { %975 = vmatprep.mubr.f32.mxu1 %v5220_v1  ;;  %3585 = vmatpush3.bf16.msra.mxu1 %v4150_v30 }
  0x30   : > { %3587 = vmatprep.subr.bf16.mxu1 %v4165_v35 }
  0x31   : > { %3561 = vmatpush3.bf16.msra.mxu0 %v4215_v52 }
  0x32   : > { %2993 = vmatmul.mubr.msk.f32.gmra.mrb[12].mxu1 %vm490_vm1, %v465_v9  ;;  %3563 = vmatprep.subr.bf16.mxu0 %v4230_v57  ;;  %v4272_v9 = vpack.c.bf16 %v1067_v5, %v1066_v4 }
  0x33   : > { %3589 = vmatpush3.bf16.msra.mxu1 %v4190_v43 }
  0x34   : > { %3591 = vmatprep.subr.bf16.mxu1 %v4203_v48 }
  0x35   : > { %3565 = vmatpush3.bf16.msra.mxu0 %v4263_v6 }
  0x36   : > { %3567 = vmatprep.subr.bf16.mxu0 %v4269_v8 }
  0x37   : > { %3593 = vmatpush3.bf16.msra.mxu1 %v4228_v56 }
  0x38   : > { %3595 = vmatprep.subr.bf16.mxu1 %v4242_v61 }
  0x3b   : > { %3597 = vmatpush3.bf16.msra.mxu1 %v4267_v7 }
  0x3c   : > { %3599 = vmatprep.subr.bf16.mxu1 %v4272_v9 }
  0x91   : > { %v4278_v10 = vpop.permute.xlu0 %470 }
  0xed   : > { %v4280_v11 = vpop.f32.mrb[0].mxu1  ;;  %v588_v12 = vpop.f32.mrb[0].mxu0 }
  0xee   : > { %v4282_v13 = vpop.f32.mrb[1].mxu1  ;;  %v590_v14 = vpop.f32.mrb[1].mxu0  ;;  %v4285_v15 = vadd.f32 %v588_v12, %v4278_v10 }
  0xef   : > { %v4288_v16 = vadd.f32 %v590_v14, %v4278_v10 }
  0xf0   : > { %v980_v19 = vsel %vm497_vm0, %v4285_v15, -inf }
  0xf1   : > { %v665_v17 = vpop.f32.mrb[2].mxu1  ;;  %v742_v18 = vpop.f32.mrb[2].mxu0  ;;  %v981_v20 = vsel %vm497_vm0, %v4288_v16, -inf }
  0xf2   : > { %v4295_v22 = vadd.f32 %v665_v17, %v4278_v10  ;;  %v667_v23 = vpop.f32.mrb[3].mxu1  ;;  %v744_v24 = vpop.f32.mrb[3].mxu0  ;;  %v984_v29 = vmax.f32 %v980_v19, %v981_v20  ;;  %v4313_v40 = vadd.f32 %v742_v18, %v4278_v10  ;;  %v1018_v18 = vld [vmem:[%s5210_s3 + $0x40] sm:$0xff]  ;;  %v1019_v19 = vld [vmem:[%s5210_s3 + $0x48] sm:$0xff] }
  0xf3   : > { %v4298_v27 = vadd.f32 %v667_v23, %v4278_v10  ;;  %v4316_v41 = vadd.f32 %v744_v24, %v4278_v10  ;;  %v1050_v20 = vld [vmem:[%s5210_s3 + $0x140] sm:$0xff]  ;;  %v4353_v23 = vpack.c.bf16 %v1019_v19, %v1018_v18  ;;  %v1051_v24 = vld [vmem:[%s5210_s3 + $0x148] sm:$0xff] }
  0xf4   : > { %v982_v28 = vsel %vm497_vm0, %v4295_v22, -inf  ;;  %v1218_v51 = vsel %vm497_vm0, %v4313_v40, -inf  ;;  %v1022_v18 = vld [vmem:[%s5210_s3 + $0x60] sm:$0xff]  ;;  %v1023_v19 = vld [vmem:[%s5210_s3 + $0x68] sm:$0xff] }
  0xf5   : > { %v983_v31 = vsel %vm497_vm0, %v4298_v27, -inf  ;;  %v4304_v32 = vpop.f32.mrb[4].mxu1  ;;  %v4306_v33 = vpop.f32.mrb[4].mxu0  ;;  %v1219_v53 = vsel %vm497_vm0, %v4316_v41, -inf  ;;  %3569 = vmatpush3.bf16.msra.mxu0 %v4353_v23 }
  0xf6   : > { %v4308_v36 = vpop.f32.mrb[5].mxu1  ;;  %v4310_v37 = vpop.f32.mrb[5].mxu0  ;;  %v985_v38 = vmax.f32 %v982_v28, %v983_v31  ;;  %v1222_v63 = vmax.f32 %v1218_v51, %v1219_v53  ;;  %v4358_v28 = vpack.c.bf16 %v1051_v24, %v1050_v20  ;;  %v1037_v31 = vld [vmem:[%s5210_s3 + $0xd8] sm:$0xff]  ;;  %v4420_v24 = vpack.c.bf16 %v1023_v19, %v1022_v18  ;;  %v1056_v18 = vld [vmem:[%s5210_s3 + $0x170] sm:$0xff] }
  0xf7   : > { %v1021_v51 = vld [vmem:[%s5210_s3 + $0x58] sm:$0xff] }
  0xf8   : > { %v986_v42 = vmax.f32 %v984_v29, %v985_v38  ;;  %v1036_v29 = vld [vmem:[%s5210_s3 + $0xd0] sm:$0xff]  ;;  %3601 = vmatpush3.bf16.msra.mxu1 %v4358_v28  ;;  %v1057_v19 = vld [vmem:[%s5210_s3 + $0x178] sm:$0xff] }
  0xf9   : > { %v819_v45 = vpop.f32.mrb[6].mxu1  ;;  %v4318_v46 = vpop.f32.mrb[6].mxu0  ;;  %v1068_v38 = vld [vmem:[%s5210_s3 + $0x1d0] sm:$0xff] }
  0xfa   : > { %v4321_v47 = vadd.f32 %v819_v45, %v4278_v10  ;;  %v821_v49 = vpop.f32.mrb[7].mxu1  ;;  %v4323_v50 = vpop.f32.mrb[7].mxu0  ;;  %987 = vmax.xlane.f32.xlu0 %v986_v42  ;;  %v4371_v42 = vpack.c.bf16 %v1037_v31, %v1036_v29  ;;  %v1069_v45 = vld [vmem:[%s5210_s3 + $0x1d8] sm:$0xff]  ;;  %v1054_v29 = vld [vmem:[%s5210_s3 + $0x160] sm:$0xff]  ;;  %v1055_v31 = vld [vmem:[%s5210_s3 + $0x168] sm:$0xff] }
  0xfb   : > { %v4330_v54 = vadd.f32 %v821_v49, %v4278_v10  ;;  %v1020_v49 = vld [vmem:[%s5210_s3 + $0x50] sm:$0xff]  ;;  %v4382_v53 = vpack.c.bf16 %v1069_v45, %v1068_v38  ;;  %v4429_v38 = vpack.c.bf16 %v1055_v31, %v1054_v29  ;;  %v4465_v29 = vpack.c.bf16 %v1057_v19, %v1056_v18 }
  0xfc   : > { %v1220_v55 = vsel %vm497_vm0, %v4321_v47, -inf  ;;  %3571 = vmatprep.subr.bf16.mxu0 %v4371_v42  ;;  %v1040_v45 = vld [vmem:[%s5210_s3 + $0xf0] sm:$0xff] }
  0xfd   : > { %v1221_v58 = vsel %vm497_vm0, %v4330_v54, -inf  ;;  %v4336_v59 = vpop.f32.mrb[8].mxu1  ;;  %v902_v60 = vpop.f32.mrb[8].mxu0  ;;  %3603 = vmatprep.subr.bf16.mxu1 %v4382_v53 }
  0xfe   : > { %5268 = vst [vmem:[#allocation3_spill] sm:$0xff] %v4336_v59  ;;  %v4338_v62 = vpop.f32.mrb[9].mxu1  ;;  %v1223_v0 = vmax.f32 %v1220_v55, %v1221_v58  ;;  %v903_v2 = vpop.f32.mrb[9].mxu0  ;;  %v4384_v55 = vpack.c.bf16 %v1021_v51, %v1020_v49  ;;  %v1052_v58 = vld [vmem:[%s5210_s3 + $0x150] sm:$0xff]  ;;  %v1053_v60 = vld [vmem:[%s5210_s3 + $0x158] sm:$0xff] }
  0xff   : > { %5269 = vst [vmem:[#allocation4_spill] sm:$0xff] %v4338_v62  ;;  %v1039_v2 = vld [vmem:[%s5210_s3 + $0xe8] sm:$0xff]  ;;  %v1041_v49 = vld [vmem:[%s5210_s3 + $0xf8] sm:$0xff]  ;;  %v1072_v51 = vld [vmem:[%s5210_s3 + $0x1f0] sm:$0xff] }
 0x100   : > { %v1224_v4 = vmax.f32 %v1222_v63, %v1223_v0  ;;  %v4393_v63 = vpack.c.bf16 %v1053_v60, %v1052_v58  ;;  %3573 = vmatpush3.bf16.msra.mxu0 %v4384_v55  ;;  %v1038_v0 = vld [vmem:[%s5210_s3 + $0xe0] sm:$0xff]  ;;  %v4443_v58 = vpack.c.bf16 %v1041_v49, %v1040_v45  ;;  %v1073_v60 = vld [vmem:[%s5210_s3 + $0x1f8] sm:$0xff] }
 0x101   : > { %v4340_v5 = vpop.f32.mrb[10].mxu1 }
 0x102   : > { %v4342_v12 = vpop.f32.mrb[11].mxu1  ;;  %1225 = vmax.xlane.f32.xlu1 %v1224_v4  ;;  %v1070_v4 = vld [vmem:[%s5210_s3 + $0x1e0] sm:$0xff]  ;;  %3605 = vmatpush3.bf16.msra.mxu1 %v4393_v63 }
 0x105   : > { %v977_v14 = vpop.f32.mrb[12].mxu1 }
 0x106   : > { %v978_v17 = vpop.f32.mrb[13].mxu1  ;;  %v4407_v14 = vpack.c.bf16 %v1039_v2, %v1038_v0  ;;  %v1024_v0 = vld [vmem:[%s5210_s3 + $0x70] sm:$0xff]  ;;  %v1025_v2 = vld [vmem:[%s5210_s3 + $0x78] sm:$0xff] }
 0x107   : > { %v1071_v17 = vld [vmem:[%s5210_s3 + $0x1e8] sm:$0xff] }
 0x108   : > { %v4418_v20 = vpack.c.bf16 %v1071_v17, %v1070_v4  ;;  %3575 = vmatprep.subr.bf16.mxu0 %v4407_v14  ;;  %v4454_v4 = vpack.c.bf16 %v1073_v60, %v1072_v51  ;;  %v4456_v17 = vpack.c.bf16 %v1025_v2, %v1024_v0 }
 0x109   : > { %3577 = vmatpush3.bf16.msra.mxu0 %v4420_v24 }
 0x10a   : > { %3607 = vmatprep.subr.bf16.mxu1 %v4418_v20  ;;  %3579 = vmatprep.subr.bf16.mxu0 %v4443_v58 }
 0x10b   : > { %3609 = vmatpush3.bf16.msra.mxu1 %v4429_v38 }
 0x10c   : > { %3611 = vmatprep.subr.bf16.mxu1 %v4454_v4 }
 0x10d   : > { %3581 = vmatpush3.bf16.msra.mxu0 %v4456_v17 }
 0x10e   : > { %3615 = vmatprep.subr.bf16.mxu0 %v4125_v21 }
 0x10f   : > { %3613 = vmatpush3.bf16.msra.mxu1 %v4465_v29 }
 0x110   : > { %3647 = vmatprep.subr.bf16.mxu1 %v4136_v25 }
 0x187   : > { %v988_v31 = vpop.xlane.xlu0 %987 }
 0x188   : > { %v989_v45 = vsub.f32 %v4285_v15, %v988_v31  ;;  %v990_v49 = vsub.f32 %v4288_v16, %v988_v31  ;;  %v991_v51 = vsub.f32 %v4295_v22, %v988_v31  ;;  %v992_v60 = vsub.f32 %v4298_v27, %v988_v31 }
 0x18a   : > { %v993_v0 = vmul.f32 1.442695, %v989_v45  ;;  %v995_v2 = vmul.f32 1.442695, %v990_v49  ;;  %v997_v18 = vmul.f32 1.442695, %v991_v51 }
 0x18b   : > { %v999_v19 = vmul.f32 1.442695, %v992_v60 }
 0x18c   : > { %3916 = vpow2.f32 %v993_v0  ;;  %v4490_v0 = vadd.f32 %v4340_v5, %v4278_v10  ;;  %v4505_v5 = vadd.f32 %v4323_v50, %v4278_v10 }
 0x18d   : > { %3918 = vpow2.f32 %v995_v2  ;;  %v4494_v2 = vadd.f32 %v4342_v12, %v4278_v10 }
 0x18e   : > { %3920 = vpow2.f32 %v997_v18 }
 0x18f   : > { %3922 = vpow2.f32 %v999_v19  ;;  %v1226_v1 = vpop.xlane.xlu1 %1225 }
 0x190   : > { %v1227_v3 = vsub.f32 %v4313_v40, %v1226_v1  ;;  %v1228_v62 = vsub.f32 %v4316_v41, %v1226_v1  ;;  %v1229_v15 = vsub.f32 %v4321_v47, %v1226_v1  ;;  %v1230_v16 = vsub.f32 %v4330_v54, %v1226_v1 }
 0x192   : > { %v1231_v22 = vmul.f32 1.442695, %v1227_v3  ;;  %v1233_v59 = vmul.f32 1.442695, %v1228_v62  ;;  %v1235_v27 = vmul.f32 1.442695, %v1229_v15 }
 0x193   : > { %v1237_v31 = vmul.f32 1.442695, %v1230_v16  ;;  %v4501_v16 = vadd.f32 %v4318_v46, %v4278_v10  ;;  %v1459_v46 = vsel %vm497_vm0, %v4494_v2, -inf }
 0x194   : > { %3924 = vpow2.f32 %v1231_v22 }
 0x195   : > { %3926 = vpow2.f32 %v1233_v59 }
 0x196   : > { %v3917_v45 = vpop.eup %3916  ;;  %3928 = vpow2.f32 %v1235_v27 }
 0x197   : > { %v3919_v49 = vpop.eup %3918  ;;  %3930 = vpow2.f32 %v1237_v31  ;;  %v1001_v51 = vsel %vm497_vm0, %v3917_v45, 0.0  ;;  %v1458_v31 = vsel %vm497_vm0, %v4490_v0, -inf }
 0x198   : > { %v3921_v60 = vpop.eup %3920  ;;  %1138 = vmatprep.mubr.f32.mxu0 %v3919_v49  ;;  %v1002_v40 = vsel %vm497_vm0, %v3919_v49, 0.0  ;;  %v1457_v49 = vsel %vm497_vm0, %v4505_v5, -inf }
 0x199   : > { %v3923_v41 = vpop.eup %3922  ;;  %1139 = vmatmul.mubr.f32.vlgmr.msra.gmra.mrb[10].mxu0 %v3917_v45  ;;  %v1003_v47 = vadd.f32 %v1002_v40, %v1001_v51  ;;  %v1004_v1 = vsel %vm497_vm0, %v3921_v60, 0.0  ;;  %v1456_v45 = vsel %vm497_vm0, %v4501_v16, -inf  ;;  %v1461_v40 = vmax.f32 %v1458_v31, %v1459_v46  ;;  %v2597_v46 = vld [vmem:[%s5215_s8 + $0x10] sm:$0xff] }
 0x19a   : > { %1208 = vmatprep.mubr.f32.mxu1 %v3923_v41  ;;  %3617 = vmatpush3.bf16.msra.mxu0 %v4138_v26  ;;  %v1006_v54 = vsel %vm497_vm0, %v3923_v41, 0.0  ;;  %v1460_v41 = vmax.f32 %v1456_v45, %v1457_v49  ;;  %v5246_v31 = vlaneseq  ;;  %v2734_v45 = vld [vmem:[#allocation2] sm:$0x1] }
 0x19b   : > { %1209 = vmatmul.mubr.f32.vlgmr.msra.gmra.mrb[14].mxu1 %v3921_v60  ;;  %3619 = vmatprep.subr.bf16.mxu0 %v4163_v34  ;;  %v1005_v3 = vadd.f32 %v1004_v1, %v1003_v47  ;;  %v3981_v1 = vmov 2  }
 0x19c   : > { %3649 = vmatpush3.bf16.msra.mxu1 %v4150_v30  ;;  %v1462_v47 = vmax.f32 %v1460_v41, %v1461_v40 }
 0x19d   : > { %3651 = vmatprep.subr.bf16.mxu1 %v4165_v35  ;;  %v1007_v59 = vadd.f32 %v1006_v54, %v1005_v3 }
 0x19e   : > { %v3925_v62 = vpop.eup %3924  ;;  %3621 = vmatpush3.bf16.msra.mxu0 %v4177_v39 }
 0x19f   : > { %v3927_v18 = vpop.eup %3926  ;;  %1008 = vadd.xlane.f32.xlu1 %v1007_v59  ;;  %3623 = vmatprep.subr.bf16.mxu0 %v4192_v44  ;;  %v1239_v19 = vsel %vm497_vm0, %v3925_v62, 0.0 }
 0x1a0   : > { %v3929_v15 = vpop.eup %3928  ;;  %3653 = vmatpush3.bf16.msra.mxu1 %v4190_v43  ;;  %1376 = vmatprep.mubr.f32.mxu0 %v3927_v18  ;;  %v1240_v12 = vsel %vm497_vm0, %v3927_v18, 0.0 }
 0x1a1   : > { %v3931_v22 = vpop.eup %3930  ;;  %3655 = vmatprep.subr.bf16.mxu1 %v4203_v48  ;;  %v1241_v27 = vadd.f32 %v1240_v12, %v1239_v19  ;;  %v1242_v10 = vsel %vm497_vm0, %v3929_v15, 0.0  ;;  %v467_v12 = vld [vmem:[%s5209_s2 + $0x8] sm:$0xff] }
 0x1a2   : > { %1446 = vmatprep.mubr.f32.mxu1 %v3931_v22  ;;  %3625 = vmatpush3.bf16.msra.mxu0 %v4215_v52  ;;  %v1244_v51 = vsel %vm497_vm0, %v3931_v22, 0.0  ;;  %v5270_v22 = vmov 0  }
 0x1a3   : > { %3627 = vmatprep.subr.bf16.mxu0 %v4230_v57  ;;  %v1243_v50 = vadd.f32 %v1242_v10, %v1241_v27  ;;  %v2595_v27 = vld [vmem:[%s5215_s8] sm:$0xff] }
 0x1a4   : > { %3657 = vmatpush3.bf16.msra.mxu1 %v4228_v56  ;;  %v4614_v10 = vld [vmem:[%s444_s22] ss:$0 sm:$0xff] }
 0x1a5   : > { %3659 = vmatprep.subr.bf16.mxu1 %v4242_v61  ;;  %v1245_v60 = vadd.f32 %v1244_v51, %v1243_v50  ;;  %v4617_v50 = vshrl.u32 %v5246_v31, 7 }
 0x1a6   : > { %3629 = vmatpush3.bf16.msra.mxu0 %v4263_v6 }
 0x1a7   : > { %1246 = vadd.xlane.f32.xlu1 %v1245_v60  ;;  %3631 = vmatprep.subr.bf16.mxu0 %v4269_v8  ;;  %5271 = vst [vmem:[#allocation5_spill] sm:$0xff] %v4617_v50  ;;  %v2065_v49 = vadd.s32 128, %v4617_v50  ;;  %v2066_v51 = vadd.s32 136, %v4617_v50  ;;  %v2097_v60 = vadd.s32 384, %v4617_v50  ;;  %v2098_v40 = vadd.s32 392, %v4617_v50 }
 0x1a8   : > { %3661 = vmatpush3.bf16.msra.mxu1 %v4267_v7  ;;  %v2050_v41 = vadd.s32 8, %v4617_v50  ;;  %vm2118_vm3 = vcmp.eq.s32.totalorder %v4617_v50, %v4614_v10 }
 0x1a9   : > { %3663 = vmatprep.subr.bf16.mxu1 %v4272_v9  ;;  %vm2134_vm4 = vcmp.eq.s32.totalorder %v2065_v49, %v4614_v10  ;;  %vm2135_vm5 = vcmp.eq.s32.totalorder %v2066_v51, %v4614_v10  ;;  %vm2166_vm6 = vcmp.eq.s32.totalorder %v2097_v60, %v4614_v10  ;;  %vm2167_vm8 = vcmp.eq.s32.totalorder %v2098_v40, %v4614_v10 }
 0x1aa   : > { %3633 = vmatpush3.bf16.msra.mxu0 %v4353_v23  ;;  %vm4631_vm7 = vmpackc.low %vm2135_vm5, %vm2134_vm4  ;;  %vm2119_vm9 = vcmp.eq.s32.totalorder %v2050_v41, %v4614_v10  ;;  %v5302_v49 = vmov 0  ;;  %v2090_v51 = vadd.s32 328, %v4617_v50  ;;  %v5305_v60 = vmov 0 }
 0x1ab   : > { %1463 = vmax.xlane.f32.xlu1 %v1462_v47  ;;  %3635 = vmatprep.subr.bf16.mxu0 %v4371_v42  ;;  %v2081_v47 = vadd.s32 256, %v4617_v50  ;;  %vm4642_vm11 = vmpackc.low %vm2167_vm8, %vm2166_vm6  ;;  %v2075_v40 = vadd.s32 208, %v4617_v50  ;;  %v2076_v41 = vadd.s32 216, %v4617_v50 }
 0x1ac   : > { %3665 = vmatpush3.bf16.msra.mxu1 %v4358_v28  ;;  %vm4656_vm13 = vmpackc.low %vm2119_vm9, %vm2118_vm3 }
 0x1ad   : > { %3667 = vmatprep.subr.bf16.mxu1 %v4382_v53  ;;  %vm2150_vm10 = vcmp.eq.s32.totalorder %v2081_v47, %v4614_v10  ;;  %v2107_v47 = vadd.s32 464, %v4617_v50 }
 0x1ae   : > { %3637 = vmatpush3.bf16.msra.mxu0 %v4384_v55 }
 0x1af   : > { %3639 = vmatprep.subr.bf16.mxu0 %v4407_v14 }
 0x1b0   : > { %3669 = vmatpush3.bf16.msra.mxu1 %v4393_v63 }
 0x1b1   : > { %3671 = vmatprep.subr.bf16.mxu1 %v4418_v20 }
 0x1b2   : > { %3641 = vmatpush3.bf16.msra.mxu0 %v4420_v24 }
 0x1b3   : > { %3643 = vmatprep.subr.bf16.mxu0 %v4443_v58 }
 0x1b4   : > { %3673 = vmatpush3.bf16.msra.mxu1 %v4429_v38 }
 0x1b5   : > { %3675 = vmatprep.subr.bf16.mxu1 %v4454_v4 }
 0x1b6   : > { %3645 = vmatpush3.bf16.msra.mxu0 %v4456_v17 }
 0x1b7   : > { %3679 = vmatprep.subr.bf16.mxu0 %v4125_v21 }
 0x1b8   : > { %3677 = vmatpush3.bf16.msra.mxu1 %v4465_v29 }
 0x1b9   : > { %1377 = vmatmul.mubr.f32.vlgmr.msra.gmra.mrb[12].mxu0 %v3925_v62  ;;  %3711 = vmatprep.subr.bf16.mxu1 %v4136_v25 }
 0x1ba   : > { %3681 = vmatpush3.bf16.msra.mxu0 %v4138_v26 }
 0x1bb   : > { %1447 = vmatmul.mubr.f32.vlgmr.msra.gmra.mrb[16].mxu1 %v3929_v15  ;;  %3683 = vmatprep.subr.bf16.mxu0 %v4163_v34 }
 0x1bc   : > { %3713 = vmatpush3.bf16.msra.mxu1 %v4150_v30 }
 0x1bd   : > { %3715 = vmatprep.subr.bf16.mxu1 %v4165_v35 }
 0x1be   : > { %3685 = vmatpush3.bf16.msra.mxu0 %v4177_v39 }
 0x1bf   : > { %3687 = vmatprep.subr.bf16.mxu0 %v4192_v44 }
 0x1c0   : > { %3717 = vmatpush3.bf16.msra.mxu1 %v4190_v43 }
 0x1c1   : > { %3719 = vmatprep.subr.bf16.mxu1 %v4203_v48 }
 0x1c2   : > { %3689 = vmatpush3.bf16.msra.mxu0 %v4215_v52 }
 0x1c3   : > { %3691 = vmatprep.subr.bf16.mxu0 %v4230_v57 }
 0x1c4   : > { %3721 = vmatpush3.bf16.msra.mxu1 %v4228_v56 }
 0x1c5   : > { %3723 = vmatprep.subr.bf16.mxu1 %v4242_v61 }
 0x1c6   : > { %3693 = vmatpush3.bf16.msra.mxu0 %v4263_v6 }
 0x1c7   : > { %3695 = vmatprep.subr.bf16.mxu0 %v4269_v8 }
 0x1c8   : > { %3725 = vmatpush3.bf16.msra.mxu1 %v4267_v7 }
 0x1c9   : > { %3727 = vmatprep.subr.bf16.mxu1 %v4272_v9 }
 0x1ca   : > { %3697 = vmatpush3.bf16.msra.mxu0 %v4353_v23 }
 0x1cb   : > { %3699 = vmatprep.subr.bf16.mxu0 %v4371_v42 }
 0x1cc   : > { %3729 = vmatpush3.bf16.msra.mxu1 %v4358_v28 }
 0x1cd   : > { %3731 = vmatprep.subr.bf16.mxu1 %v4382_v53 }
 0x1ce   : > { %3701 = vmatpush3.bf16.msra.mxu0 %v4384_v55 }
 0x1cf   : > { %3703 = vmatprep.subr.bf16.mxu0 %v4407_v14 }
 0x1d0   : > { %3733 = vmatpush3.bf16.msra.mxu1 %v4393_v63 }
 0x1d1   : > { %3735 = vmatprep.subr.bf16.mxu1 %v4418_v20 }
 0x1d2   : > { %3705 = vmatpush3.bf16.msra.mxu0 %v4420_v24 }
 0x1d3   : > { %3707 = vmatprep.subr.bf16.mxu0 %v4443_v58 }
 0x1d4   : > { %3737 = vmatpush3.bf16.msra.mxu1 %v4429_v38 }
 0x1d5   : > { %3739 = vmatprep.subr.bf16.mxu1 %v4454_v4 }
 0x1d6   : > { %3709 = vmatpush3.bf16.msra.mxu0 %v4456_v17 }
 0x1d8   : > { %3741 = vmatpush3.bf16.msra.mxu1 %v4465_v29  ;;  %v3980_v29 = vmov 1  }
 0x22c   : > { %v1009_v21 = vpop.xlane.xlu1 %1008 }
 0x234   : > { %v1247_v25 = vpop.xlane.xlu1 %1246 }
 0x238   : > { %v1464_v26 = vpop.xlane.xlu1 %1463 }
 0x239   : > { %v1465_v30 = vsub.f32 %v4501_v16, %v1464_v26  ;;  %v1466_v34 = vsub.f32 %v4505_v5, %v1464_v26  ;;  %v1467_v35 = vsub.f32 %v4490_v0, %v1464_v26  ;;  %v1468_v39 = vsub.f32 %v4494_v2, %v1464_v26  ;;  %v2596_v16 = vld [vmem:[%s5215_s8 + $0x8] sm:$0xff]  ;;  %v2598_v5 = vld [vmem:[%s5215_s8 + $0x18] sm:$0xff] }
 0x23a   : > { %v2067_v26 = vadd.s32 144, %v4617_v50 }
 0x23b   : > { %v1469_v43 = vmul.f32 1.442695, %v1465_v30  ;;  %v1471_v44 = vmul.f32 1.442695, %v1466_v34  ;;  %v1473_v48 = vmul.f32 1.442695, %v1467_v35 }
 0x23c   : > { %v1475_v52 = vmul.f32 1.442695, %v1468_v39  ;;  %v5247_v30 = vmov 1.0|1.0   ;;  %v2068_v35 = vadd.s32 152, %v4617_v50  ;;  %v2099_v39 = vadd.s32 400, %v4617_v50 }
 0x23d   : > { %3932 = vpow2.f32 %v1469_v43  ;;  %3743 = vmatprep.subr.msk.bf16.mxu0 %vm4631_vm7, %v5247_v30  ;;  %v2100_v43 = vadd.s32 408, %v4617_v50  ;;  %3775 = vmatprep.subr.msk.bf16.mxu1 %vm4642_vm11, %v5247_v30  ;;  %vm2136_vm14 = vcmp.eq.s32.totalorder %v2067_v26, %v4614_v10  ;;  %v5311_v26 = vmov 0 }
 0x23e   : > { %3934 = vpow2.f32 %v1471_v44  ;;  %vm2168_vm1 = vcmp.eq.s32.totalorder %v2099_v39, %v4614_v10  ;;  %v2060_v39 = vadd.s32 88, %v4617_v50 }
 0x23f   : > { %3936 = vpow2.f32 %v1473_v48  ;;  %v2051_v48 = vadd.s32 16, %v4617_v50  ;;  %vm2169_vm3 = vcmp.eq.s32.totalorder %v2100_v43, %v4614_v10  ;;  %v2091_v43 = vadd.s32 336, %v4617_v50 }
 0x240   : > { %3938 = vpow2.f32 %v1475_v52  ;;  %v2052_v52 = vadd.s32 24, %v4617_v50  ;;  %vm4691_vm9 = vmpackc.low %vm2169_vm3, %vm2168_vm1 }
 0x241   : > { %3940 = vrcp.f32 %v1009_v21  ;;  %v2082_v21 = vadd.s32 264, %v4617_v50  ;;  %vm2120_vm5 = vcmp.eq.s32.totalorder %v2051_v48, %v4614_v10  ;;  %v5314_v48 = vmov 0 }
 0x242   : > { %3942 = vrcp.f32 %v1247_v25  ;;  %vm2121_vm6 = vcmp.eq.s32.totalorder %v2052_v52, %v4614_v10  ;;  %v2092_v52 = vadd.s32 344, %v4617_v50  ;;  %v2997_v25 = vld [vmem:[%s5211_s4 + $0x2] ss:$4 sm:$0xf] }
 0x243   : > { %vm2151_vm12 = vcmp.eq.s32.totalorder %v2082_v21, %v4614_v10  ;;  %v2108_v21 = vadd.s32 472, %v4617_v50 }
 0x244   : > { %vm4669_vm15 = vmpackc.low %vm2151_vm12, %vm2150_vm10 }
 0x245   : > { %vm4702_vm12 = vmpackc.low %vm2121_vm6, %vm2120_vm5 }
 0x247   : > { %v3933_v56 = vpop.eup %3932 }
 0x248   : > { %v3935_v57 = vpop.eup %3934  ;;  %v1477_v61 = vsel %vm497_vm0, %v3933_v56, 0.0 }
 0x249   : > { %v3937_v6 = vpop.eup %3936  ;;  %1614 = vmatprep.mubr.f32.mxu0 %v3935_v57  ;;  %v1478_v7 = vsel %vm497_vm0, %v3935_v57, 0.0 }
 0x24a   : > { %v3939_v8 = vpop.eup %3938  ;;  %1615 = vmatmul.mubr.f32.vlgmr.msra.gmra.mrb[14].mxu0 %v3933_v56  ;;  %v1479_v9 = vadd.f32 %v1478_v7, %v1477_v61  ;;  %v1480_v23 = vsel %vm497_vm0, %v3937_v6, 0.0  ;;  %v2083_v56 = vadd.s32 272, %v4617_v50  ;;  %v2084_v61 = vadd.s32 280, %v4617_v50 }
 0x24b   : > { %1684 = vmatprep.mubr.f32.mxu1 %v3939_v8  ;;  %v1482_v42 = vsel %vm497_vm0, %v3939_v8, 0.0  ;;  %v3941_v4 = vpop.eup %3940  ;;  %3745 = vmatpush3.bf16.msk.msra.mxu0 %vm4656_vm13, %v5247_v30  ;;  %vm2137_vm0 = vcmp.eq.s32.totalorder %v2068_v35, %v4614_v10  ;;  %v2069_v7 = vadd.s32 160, %v4617_v50  ;;  %v2059_v35 = vadd.s32 80, %v4617_v50 }
 0x24c   : > { %1685 = vmatmul.mubr.f32.vlgmr.msra.gmra.mrb[18].mxu1 %v3937_v6  ;;  %v1481_v28 = vadd.f32 %v1480_v23, %v1479_v9  ;;  %v3943_v19 = vpop.eup %3942  ;;  %vm4680_vm4 = vmpackc.low %vm2137_vm0, %vm2136_vm14  ;;  %vm2152_vm8 = vcmp.eq.s32.totalorder %v2083_v56, %v4614_v10  ;;  %vm2153_vm10 = vcmp.eq.s32.totalorder %v2084_v61, %v4614_v10  ;;  %v2070_v9 = vadd.s32 168, %v4617_v50 }
 0x24d   : > { %3777 = vmatpush3.bf16.msk.msra.mxu1 %vm4669_vm15, %v5247_v30  ;;  %3747 = vmatprep.subr.msk.bf16.mxu0 %vm4680_vm4, %v5247_v30  ;;  %v2101_v23 = vadd.s32 416, %v4617_v50  ;;  %vm2138_vm14 = vcmp.eq.s32.totalorder %v2069_v7, %v4614_v10  ;;  %vm4715_vm0 = vmpackc.low %vm2153_vm10, %vm2152_vm8  ;;  %v5317_v56 = vmov 0  ;;  %v2077_v61 = vadd.s32 224, %v4617_v50 }
 0x24e   : > { %v4582_v53 = vadd.f32 %v1482_v42, %v1481_v28  ;;  %v2102_v28 = vadd.s32 424, %v4617_v50  ;;  %3779 = vmatprep.subr.msk.bf16.mxu1 %vm4691_vm9, %v5247_v30  ;;  %v5284_v42 = vmov 0  ;;  %vm2139_vm1 = vcmp.eq.s32.totalorder %v2070_v9, %v4614_v10 }
 0x24f   : > { %v5285_v42 = vsel %vm4702_vm12, 4294967295, %v5284_v42  ;;  %3749 = vmatpush3.bf16.msk.msra.mxu0 %vm4702_vm12, %v5247_v30  ;;  %vm2170_vm3 = vcmp.eq.s32.totalorder %v2101_v23, %v4614_v10  ;;  %vm4726_vm6 = vmpackc.low %vm2139_vm1, %vm2138_vm14  ;;  %v5320_v7 = vmov 0  ;;  %v2078_v9 = vadd.s32 232, %v4617_v50 }
 0x250   : > { %vm2171_vm5 = vcmp.eq.s32.totalorder %v2102_v28, %v4614_v10  ;;  %3751 = vmatprep.subr.msk.bf16.mxu0 %vm4726_vm6, %v5247_v30  ;;  %v2109_v23 = vadd.s32 480, %v4617_v50  ;;  %v2110_v28 = vadd.s32 488, %v4617_v50 }
 0x251   : > { %3781 = vmatpush3.bf16.msk.msra.mxu1 %vm4715_vm0, %v5247_v30  ;;  %vm4737_vm12 = vmpackc.low %vm2171_vm5, %vm2170_vm3 }
 0x252   : > { %3783 = vmatprep.subr.msk.bf16.mxu1 %vm4737_vm12, %v5247_v30 }
 0x26c   : > { %v3232_v55 = vpop.f32.mrb[10].mxu0 }
 0x26d   : > { %v3233_v63 = vpop.f32.mrb[11].mxu0 }
 0x26e   : > { %v3267_v14 = vpop.f32.mrb[14].mxu1  ;;  %v3234_v20 = vadd.f32 %v3233_v63, %v3232_v55  ;;  %v2053_v55 = vadd.s32 32, %v4617_v50  ;;  %v2054_v63 = vadd.s32 40, %v4617_v50 }
 0x26f   : > { %v3268_v24 = vpop.f32.mrb[15].mxu1 }
 0x270   : > { %v3269_v38 = vadd.f32 %v3268_v24, %v3267_v14  ;;  %v2085_v14 = vadd.s32 288, %v4617_v50  ;;  %v2086_v24 = vadd.s32 296, %v4617_v50  ;;  %vm2122_vm8 = vcmp.eq.s32.totalorder %v2053_v55, %v4614_v10 }
 0x271   : > { %vm2123_vm10 = vcmp.eq.s32.totalorder %v2054_v63, %v4614_v10  ;;  %v5323_v55 = vmov 0  ;;  %v2061_v63 = vadd.s32 96, %v4617_v50 }
 0x272   : > { %v1211_v58 = vadd.f32 %v3269_v38, %v3234_v20  ;;  %v5286_v20 = vmov 0  ;;  %v5288_v38 = vmov 0  ;;  %vm2155_vm14 = vcmp.eq.s32.totalorder %v2086_v24, %v4614_v10  ;;  %vm4748_vm1 = vmpackc.low %vm2123_vm10, %vm2122_vm8 }
 0x273   : > { %v5287_v20 = vsel %vm4715_vm0, 4294967295, %v5286_v20  ;;  %v5289_v38 = vsel %vm4726_vm6, 4294967295, %v5288_v38  ;;  %3753 = vmatpush3.bf16.msk.msra.mxu0 %vm4748_vm1, %v5247_v30  ;;  %v2093_v24 = vadd.s32 352, %v4617_v50 }
 0x274   : > { %v1215_v17 = vmul.f32 %v3941_v4, %v1211_v58  ;;  %v2071_v58 = vadd.s32 176, %v4617_v50  ;;  %v5290_v4 = vmov 0 }
 0x275   : > { %v5291_v4 = vsel %vm4737_vm12, 4294967295, %v5290_v4 }
 0x276   : > { %1217 = vst.msk [vmem:[%s4588_s29] sm:$0xf] %vm5223_vm2, %v1215_v17  ;;  %1722 = vperm.xlu1 %3904, %v1215_v17   ;;  %vm2140_vm3 = vcmp.eq.s32.totalorder %v2071_v58, %v4614_v10  ;;  %v5326_v58 = vmov 0 }
 0x27a   : > { %3905 = vset.pattern.permute.xlu1 %v3980_v29 }
 0x27b   : > { %1755 = vperm.xlu1 %3905, %v1215_v17  }
 0x27f   : > { %3906 = vset.pattern.permute.xlu1 %v3981_v1 }
 0x280   : > { %1792 = vperm.xlu1 %3906, %v1215_v17   ;;  %v2072_v17 = vadd.s32 184, %v4617_v50 }
 0x282   : > { %vm2141_vm8 = vcmp.eq.s32.totalorder %v2072_v17, %v4614_v10  ;;  %v2094_v17 = vadd.s32 360, %v4617_v50 }
 0x283   : > { %vm4772_vm0 = vmpackc.low %vm2141_vm8, %vm2140_vm3 }
 0x284   : > { %3907 = vset.pattern.permute.xlu1 %v3980_v29  ;;  %v2103_v29 = vadd.s32 432, %v4617_v50  ;;  %3755 = vmatprep.subr.msk.bf16.mxu0 %vm4772_vm0, %v5247_v30 }
 0x286   : > { %vm2172_vm10 = vcmp.eq.s32.totalorder %v2103_v29, %v4614_v10  ;;  %v5329_v29 = vmov 0 }
 0x28c   : > { %v3302_v3 = vpop.f32.mrb[12].mxu0 }
 0x28d   : > { %v3303_v54 = vpop.f32.mrb[13].mxu0 }
 0x28e   : > { %v3337_v59 = vpop.f32.mrb[16].mxu1  ;;  %v3304_v62 = vadd.f32 %v3303_v54, %v3302_v3  ;;  %v5292_v3 = vmov 0  ;;  %v2055_v54 = vadd.s32 48, %v4617_v50 }
 0x28f   : > { %v3338_v0 = vpop.f32.mrb[17].mxu1  ;;  %v5293_v3 = vsel %vm4748_vm1, 4294967295, %v5292_v3 }
 0x290   : > { %v3339_v2 = vadd.f32 %v3338_v0, %v3337_v59  ;;  %v2056_v59 = vadd.s32 56, %v4617_v50  ;;  %v5294_v0 = vmov 0 }
 0x292   : > { %v1449_v18 = vadd.f32 %v3339_v2, %v3304_v62  ;;  %v2087_v62 = vadd.s32 304, %v4617_v50  ;;  %v2088_v2 = vadd.s32 312, %v4617_v50 }
 0x294   : > { %v1453_v15 = vmul.f32 %v3943_v19, %v1449_v18  ;;  %v5296_v18 = vmov 0  ;;  %vm2156_vm1 = vcmp.eq.s32.totalorder %v2087_v62, %v4614_v10  ;;  %v2073_v19 = vadd.s32 192, %v4617_v50 }
 0x295   : > { %v5297_v18 = vsel %vm4772_vm0, 4294967295, %v5296_v18  ;;  %vm2157_vm3 = vcmp.eq.s32.totalorder %v2088_v2, %v4614_v10  ;;  %v2111_v62 = vadd.s32 496, %v4617_v50  ;;  %v2112_v2 = vadd.s32 504, %v4617_v50 }
 0x296   : > { %2994 = vst.msk [vmem:[%s4588_s29 + $0x4] sm:$0xf] %vm5223_vm2, %v1453_v15  ;;  %1837 = vperm.xlu1 %3907, %v1453_v15   ;;  %1825 = vperm.xlu0 %3903, %v1453_v15   ;;  %vm2154_vm2 = vcmp.eq.s32.totalorder %v2085_v14, %v4614_v10  ;;  %v2062_v14 = vadd.s32 104, %v4617_v50 }
 0x297   : > { %vm4761_vm5 = vmpackc.low %vm2155_vm14, %vm2154_vm2  ;;  %vm2124_vm2 = vcmp.eq.s32.totalorder %v2055_v54, %v4614_v10  ;;  %vm2125_vm14 = vcmp.eq.s32.totalorder %v2056_v59, %v4614_v10  ;;  %v5332_v54 = vmov 0  ;;  %v2080_v59 = vadd.s32 248, %v4617_v50 }
 0x298   : > { %v5295_v0 = vsel %vm4761_vm5, 4294967295, %v5294_v0  ;;  %3785 = vmatpush3.bf16.msk.msra.mxu1 %vm4761_vm5, %v5247_v30  ;;  %vm4794_vm8 = vmpackc.low %vm2125_vm14, %vm2124_vm2 }
 0x299   : > { %3757 = vmatpush3.bf16.msk.msra.mxu0 %vm4794_vm8, %v5247_v30 }
 0x29a   : > { %3908 = vset.pattern.permute.xlu1 %v3981_v1  ;;  %2606 = vperm.xlu0 %3903, %v2596_v16   ;;  %v2104_v1 = vadd.s32 440, %v4617_v50  ;;  %v2074_v16 = vadd.s32 200, %v4617_v50 }
 0x29b   : > { %1853 = vperm.xlu1 %3908, %v1453_v15   ;;  %v5298_v15 = vmov 0 }
 0x29c   : > { %vm2173_vm12 = vcmp.eq.s32.totalorder %v2104_v1, %v4614_v10  ;;  %vm2143_vm2 = vcmp.eq.s32.totalorder %v2074_v16, %v4614_v10  ;;  %v2079_v1 = vadd.s32 240, %v4617_v50  ;;  %v2063_v16 = vadd.s32 112, %v4617_v50 }
 0x29d   : > { %vm4783_vm6 = vmpackc.low %vm2173_vm12, %vm2172_vm10  ;;  %vm2142_vm12 = vcmp.eq.s32.totalorder %v2073_v19, %v4614_v10  ;;  %v5335_v19 = vmov 0 }
 0x29e   : > { %2616 = vperm.xlu0 %3903, %v2598_v5   ;;  %v5299_v15 = vsel %vm4783_vm6, 4294967295, %v5298_v15  ;;  %v2105_v5 = vadd.s32 448, %v4617_v50  ;;  %3787 = vmatprep.subr.msk.bf16.mxu1 %vm4783_vm6, %v5247_v30  ;;  %vm4807_vm10 = vmpackc.low %vm2157_vm3, %vm2156_vm1 }
 0x29f   : > { %3909 = vset.pattern.permute.xlu1 %v5270_v22  ;;  %v5300_v22 = vmov 0  ;;  %v5303_v49 = vsel %vm4807_vm10, 4294967295, %v5302_v49  ;;  %3789 = vmatpush3.bf16.msk.msra.mxu1 %vm4807_vm10, %v5247_v30 }
 0x2a0   : > { %475 = vperm.xlu1 %3909, %v467_v12   ;;  %v2106_v12 = vadd.s32 456, %v4617_v50  ;;  %v5301_v22 = vsel %vm4794_vm8, 4294967295, %v5300_v22  ;;  %5304 = vst [vmem:[#allocation6_spill] sm:$0xff] %v5303_v49  ;;  %vm2174_vm14 = vcmp.eq.s32.totalorder %v2105_v5, %v4614_v10  ;;  %vm4819_vm8 = vmpackc.low %vm2143_vm2, %vm2142_vm12  ;;  %vm2159_vm12 = vcmp.eq.s32.totalorder %v2090_v51, %v4614_v10 }
 0x2a1   : > { %v5306_v60 = vsel %vm4819_vm8, 4294967295, %v5305_v60  ;;  %3759 = vmatprep.subr.msk.bf16.mxu0 %vm4819_vm8, %v5247_v30  ;;  %v2064_v5 = vadd.s32 120, %v4617_v50  ;;  %v5344_v51 = vmov 0 }
 0x2a2   : > { %vm2175_vm6 = vcmp.eq.s32.totalorder %v2106_v12, %v4614_v10  ;;  %5307 = vst [vmem:[#allocation7_spill] sm:$0xff] %v5306_v60  ;;  %v2095_v12 = vadd.s32 368, %v4617_v50 }
 0x2a3   : > { %vm4830_vm0 = vmpackc.low %vm2175_vm6, %vm2174_vm14  ;;  %vm2144_vm6 = vcmp.eq.s32.totalorder %v2075_v40, %v4614_v10  ;;  %v5347_v40 = vmov 0 }
 0x2a4   : > { %2601 = vperm.xlu1 %3909, %v2595_v27   ;;  %v2057_v27 = vadd.s32 64, %v4617_v50  ;;  %3791 = vmatprep.subr.msk.bf16.mxu1 %vm4830_vm0, %v5247_v30 }
 0x2a6   : > { %vm2126_vm1 = vcmp.eq.s32.totalorder %v2057_v27, %v4614_v10  ;;  %v5338_v27 = vmov 0 }
 0x2a7   : > { %v5369_v8 = vld [vmem:[#allocation6_spill] sm:$0xff] }
 0x2a8   : > { %2611 = vperm.xlu1 %3909, %v2597_v46   ;;  %v2058_v46 = vadd.s32 72, %v4617_v50 }
 0x2a9   : > { %v5367_v6 = vld [vmem:[#allocation7_spill] sm:$0xff] }
 0x2aa   : > { %vm2127_vm3 = vcmp.eq.s32.totalorder %v2058_v46, %v4614_v10  ;;  %v2096_v46 = vadd.s32 376, %v4617_v50 }
 0x2ab   : > { %vm4841_vm2 = vmpackc.low %vm2127_vm3, %vm2126_vm1  ;;  %vm2145_vm1 = vcmp.eq.s32.totalorder %v2076_v41, %v4614_v10  ;;  %vm2176_vm3 = vcmp.eq.s32.totalorder %v2107_v47, %v4614_v10  ;;  %v5350_v41 = vmov 0  ;;  %v2996_v47 = vld [vmem:[%s5211_s4 + $0x1] ss:$4 sm:$0xf] }
 0x2ac   : > { %2737 = vperm.xlu1 %3909, %v2734_v45   ;;  %v2089_v45 = vadd.s32 320, %v4617_v50  ;;  %v5312_v26 = vsel %vm4841_vm2, 4294967295, %v5311_v26  ;;  %3761 = vmatpush3.bf16.msk.msra.mxu0 %vm4841_vm2, %v5247_v30  ;;  %vm4865_vm10 = vmpackc.low %vm2145_vm1, %vm2144_vm6  ;;  %vm2160_vm2 = vcmp.eq.s32.totalorder %v2091_v43, %v4614_v10  ;;  %vm2161_vm6 = vcmp.eq.s32.totalorder %v2092_v52, %v4614_v10 }
 0x2ad   : > { %5313 = vst [vmem:[#allocation9_spill] sm:$0xff] %v5312_v26  ;;  %v5318_v56 = vsel %vm4865_vm10, 4294967295, %v5317_v56  ;;  %3763 = vmatprep.subr.msk.bf16.mxu0 %vm4865_vm10, %v5247_v30  ;;  %v1706_v43 = vsub.s32 1, %v4617_v50  ;;  %v1710_v52 = vsub.s32 2, %v4617_v50 }
 0x2ae   : > { %vm2158_vm5 = vcmp.eq.s32.totalorder %v2089_v45, %v4614_v10  ;;  %5319 = vst [vmem:[#allocation11_spill] sm:$0xff] %v5318_v56  ;;  %v5341_v45 = vmov 0 }
 0x2af   : > { %vm4854_vm14 = vmpackc.low %vm2159_vm12, %vm2158_vm5  ;;  %vm2128_vm5 = vcmp.eq.s32.totalorder %v2059_v35, %v4614_v10  ;;  %vm2129_vm12 = vcmp.eq.s32.totalorder %v2060_v39, %v4614_v10  ;;  %v4999_v35 = vsub.s32 0, %v4617_v50  ;;  %v1694_v39 = vld [vmem:[%s5211_s4] ss:$4 sm:$0xf] }
 0x2b0   : > { %v5315_v48 = vsel %vm4854_vm14, 4294967295, %v5314_v48  ;;  %3793 = vmatpush3.bf16.msk.msra.mxu1 %vm4854_vm14, %v5247_v30  ;;  %vm4887_vm1 = vmpackc.low %vm2129_vm12, %vm2128_vm5  ;;  %vm2147_vm5 = vcmp.eq.s32.totalorder %v2078_v9, %v4614_v10  ;;  %vm2178_vm12 = vcmp.eq.s32.totalorder %v2109_v23, %v4614_v10 }
 0x2b1   : > { %5316 = vst [vmem:[#allocation10_spill] sm:$0xff] %v5315_v48  ;;  %v5324_v55 = vsel %vm4887_vm1, 4294967295, %v5323_v55  ;;  %3765 = vmatpush3.bf16.msk.msra.mxu0 %vm4887_vm1, %v5247_v30  ;;  %vm2162_vm1 = vcmp.eq.s32.totalorder %v2093_v24, %v4614_v10  ;;  %5353 = vst [vmem:[#allocation23_spill] sm:$0xff] %v4999_v35  ;;  %v1737_v34 = vrot.slane %v2996_v47, %v4999_v35 }
 0x2b2   : > { %5325 = vst [vmem:[#allocation13_spill] sm:$0xff] %v5324_v55  ;;  %v1703_v9 = vrot.slane %v1694_v39, %v4999_v35  ;;  %v5015_v23 = vrot.slane %v2997_v25, %v4999_v35 }
 0x2bd   : > { %1484 = vadd.xlane.f32.xlu0 %v4582_v53  ;;  %v5308_v53 = vmov 0 }
 0x2be   : > { %v5309_v53 = vsel %vm4830_vm0, 4294967295, %v5308_v53  ;;  %vm2177_vm0 = vcmp.eq.s32.totalorder %v2108_v21, %v4614_v10 }
 0x2bf   : > { %5310 = vst [vmem:[#allocation8_spill] sm:$0xff] %v5309_v53  ;;  %vm4876_vm8 = vmpackc.low %vm2177_vm0, %vm2176_vm3  ;;  %vm2146_vm0 = vcmp.eq.s32.totalorder %v2077_v61, %v4614_v10  ;;  %v5011_v61 = vsub.s32 3, %v4617_v50 }
 0x2c0   : > { %v5321_v7 = vsel %vm4876_vm8, 4294967295, %v5320_v7  ;;  %3795 = vmatprep.subr.msk.bf16.mxu1 %vm4876_vm8, %v5247_v30  ;;  %vm4900_vm3 = vmpackc.low %vm2161_vm6, %vm2160_vm2  ;;  %vm2179_vm8 = vcmp.eq.s32.totalorder %v2110_v28, %v4614_v10  ;;  %vm2130_vm2 = vcmp.eq.s32.totalorder %v2061_v63, %v4614_v10  ;;  %vm2131_vm6 = vcmp.eq.s32.totalorder %v2062_v14, %v4614_v10 }
 0x2c1   : > { %5322 = vst [vmem:[#allocation12_spill] sm:$0xff] %v5321_v7  ;;  %v5327_v58 = vsel %vm4900_vm3, 4294967295, %v5326_v58  ;;  %3797 = vmatpush3.bf16.msk.msra.mxu1 %vm4900_vm3, %v5247_v30  ;;  %vm4911_vm14 = vmpackc.low %vm2147_vm5, %vm2146_vm0  ;;  %vm2163_vm0 = vcmp.eq.s32.totalorder %v2094_v17, %v4614_v10  ;;  %v1741_v28 = vrot.slane %v2996_v47, %v1706_v43  ;;  %v1745_v14 = vrot.slane %v2996_v47, %v1710_v52 }
 0x2c2   : > { %5328 = vst [vmem:[#allocation14_spill] sm:$0xff] %v5327_v58  ;;  %v5330_v29 = vsel %vm4911_vm14, 4294967295, %v5329_v29  ;;  %3767 = vmatprep.subr.msk.bf16.mxu0 %vm4911_vm14, %v5247_v30  ;;  %vm4922_vm10 = vmpackc.low %vm2179_vm8, %vm2178_vm12  ;;  %vm2148_vm8 = vcmp.eq.s32.totalorder %v2079_v1, %v4614_v10  ;;  %v1749_v24 = vrot.slane %v2996_v47, %v5011_v61  ;;  %v1707_v1 = vrot.slane %v1694_v39, %v1706_v43 }
 0x2c3   : > { %5331 = vst [vmem:[#allocation15_spill] sm:$0xff] %v5330_v29  ;;  %v5333_v54 = vsel %vm4922_vm10, 4294967295, %v5332_v54  ;;  %3799 = vmatprep.subr.msk.bf16.mxu1 %vm4922_vm10, %v5247_v30  ;;  %vm4933_vm5 = vmpackc.low %vm2131_vm6, %vm2130_vm2  ;;  %vm2149_vm2 = vcmp.eq.s32.totalorder %v2080_v59, %v4614_v10  ;;  %vm2180_vm6 = vcmp.eq.s32.totalorder %v2111_v62, %v4614_v10  ;;  %vm2181_vm10 = vcmp.eq.s32.totalorder %v2112_v2, %v4614_v10 }
 0x2c4   : > { %5334 = vst [vmem:[#allocation16_spill] sm:$0xff] %v5333_v54  ;;  %v5336_v19 = vsel %vm4933_vm5, 4294967295, %v5335_v19  ;;  %3769 = vmatpush3.bf16.msk.msra.mxu0 %vm4933_vm5, %v5247_v30  ;;  %vm4946_vm12 = vmpackc.low %vm2163_vm0, %vm2162_vm1  ;;  %vm2132_vm1 = vcmp.eq.s32.totalorder %v2063_v16, %v4614_v10  ;;  %vm2133_vm0 = vcmp.eq.s32.totalorder %v2064_v5, %v4614_v10  ;;  %vm2164_vm5 = vcmp.eq.s32.totalorder %v2095_v12, %v4614_v10 }
 0x2c5   : > { %5337 = vst [vmem:[#allocation17_spill] sm:$0xff] %v5336_v19  ;;  %v5339_v27 = vsel %vm4946_vm12, 4294967295, %v5338_v27  ;;  %3801 = vmatpush3.bf16.msk.msra.mxu1 %vm4946_vm12, %v5247_v30  ;;  %vm4957_vm3 = vmpackc.low %vm2149_vm2, %vm2148_vm8  ;;  %vm2165_vm12 = vcmp.eq.s32.totalorder %v2096_v46, %v4614_v10  ;;  %v1711_v59 = vrot.slane %v1694_v39, %v1710_v52  ;;  %v1715_v62 = vrot.slane %v1694_v39, %v5011_v61 }
 0x2c6   : > { %5340 = vst [vmem:[#allocation18_spill] sm:$0xff] %v5339_v27  ;;  %v5342_v45 = vsel %vm4957_vm3, 4294967295, %v5341_v45  ;;  %3771 = vmatprep.subr.msk.bf16.mxu0 %vm4957_vm3, %v5247_v30  ;;  %vm4967_vm14 = vmpackc.low %vm2181_vm10, %vm2180_vm6  ;;  %v1778_v2 = vrot.slane %v2997_v25, %v1706_v43  ;;  %v1782_v5 = vrot.slane %v2997_v25, %v1710_v52  ;;  %v1786_v12 = vrot.slane %v2997_v25, %v5011_v61 }
 0x2c7   : > { %5343 = vst [vmem:[#allocation19_spill] sm:$0xff] %v5342_v45  ;;  %v5345_v51 = vsel %vm4967_vm14, 4294967295, %v5344_v51  ;;  %3803 = vmatprep.subr.msk.bf16.mxu1 %vm4967_vm14, %v5247_v30  ;;  %vm4975_vm8 = vmpackc.low %vm2133_vm0, %vm2132_vm1  ;;  %vm5363_vm10 = vnez %v5297_v18  ;;  %vm5366_vm6 = vnez %v5301_v22  ;;  %vm5368_vm1 = vnez %v5367_v6 }
 0x2c8   : > { %5346 = vst [vmem:[#allocation20_spill] sm:$0xff] %v5345_v51  ;;  %v5348_v40 = vsel %vm4975_vm8, 4294967295, %v5347_v40  ;;  %3773 = vmatpush3.bf16.msk.msra.mxu0 %vm4975_vm8, %v5247_v30  ;;  %vm4982_vm2 = vmpackc.low %vm2165_vm12, %vm2164_vm5  ;;  %vm5364_vm5 = vnez %v5295_v0  ;;  %vm5365_vm12 = vnez %v5299_v15  ;;  %vm5370_vm0 = vnez %v5369_v8  ;;  %v5381_v0 = vld [vmem:[#allocation13_spill] sm:$0xff] }
 0x2c9   : > { %5349 = vst [vmem:[#allocation21_spill] sm:$0xff] %v5348_v40  ;;  %v5351_v41 = vsel %vm4982_vm2, 4294967295, %v5350_v41  ;;  %3805 = vmatpush3.bf16.msk.msra.mxu1 %vm4982_vm2, %v5247_v30  ;;  %3807 = vmatprep.subr.msk.bf16.mxu0 %vm4631_vm7, %v5247_v30  ;;  %vm5357_vm7 = vnez %v5285_v42  ;;  %v5371_v42 = vld [vmem:[#allocation8_spill] sm:$0xff]  ;;  %v5385_v15 = vld [vmem:[#allocation14_spill] sm:$0xff] }
 0x2ca   : > { %5352 = vst [vmem:[#allocation22_spill] sm:$0xff] %v5351_v41  ;;  %3839 = vmatprep.subr.msk.bf16.mxu1 %vm4642_vm11, %v5247_v30  ;;  %vm5358_vm11 = vnez %v5289_v38  ;;  %v5375_v38 = vld [vmem:[#allocation11_spill] sm:$0xff] }
 0x2cb   : > { %v5383_v18 = vld [vmem:[#allocation15_spill] sm:$0xff]  ;;  %v5387_v22 = vld [vmem:[#allocation16_spill] sm:$0xff] }
 0x2f5   : > { %v1723_v10 = vpop.permute.xlu1 %1722 }
 0x2f6   : > { %v1725_v16 = vsub.f32 %v1703_v9, %v1723_v10  ;;  %v1726_v41 = vsub.f32 %v1707_v1, %v1723_v10  ;;  %v1727_v40 = vsub.f32 %v1711_v59, %v1723_v10  ;;  %v1728_v51 = vsub.f32 %v1715_v62, %v1723_v10 }
 0x2f8   : > { %v1729_v27 = vmul.f32 %v1725_v16, %v1725_v16  ;;  %v1730_v29 = vmul.f32 %v1726_v41, %v1726_v41  ;;  %v1731_v25 = vmul.f32 %v1727_v40, %v1727_v40  ;;  %v1732_v7 = vmul.f32 %v1728_v51, %v1728_v51 }
 0x2fa   : > { %v1756_v21 = vpop.permute.xlu1 %1755 }
 0x2fb   : > { %v1758_v17 = vsub.f32 %v1737_v34, %v1756_v21  ;;  %v1759_v31 = vsub.f32 %v1741_v28, %v1756_v21  ;;  %v1760_v30 = vsub.f32 %v1745_v14, %v1756_v21  ;;  %v1761_v50 = vsub.f32 %v1749_v24, %v1756_v21 }
 0x2fd   : > { %v1762_v35 = vmul.f32 %v1758_v17, %v1758_v17  ;;  %v1763_v39 = vmul.f32 %v1759_v31, %v1759_v31  ;;  %v1764_v43 = vmul.f32 %v1760_v30, %v1760_v30  ;;  %v1765_v58 = vmul.f32 %v1761_v50, %v1761_v50 }
 0x2ff   : > { %v1793_v63 = vpop.permute.xlu1 %1792  ;;  %v1766_v52 = vadd.f32 %v1762_v35, %v1729_v27  ;;  %v1767_v17 = vadd.f32 %v1763_v39, %v1730_v29  ;;  %v1768_v26 = vadd.f32 %v1764_v43, %v1731_v25  ;;  %v1769_v53 = vadd.f32 %v1765_v58, %v1732_v7 }
 0x300   : > { %v1795_v46 = vsub.f32 %v5015_v23, %v1793_v63  ;;  %v1796_v47 = vsub.f32 %v1778_v2, %v1793_v63  ;;  %v1797_v45 = vsub.f32 %v1782_v5, %v1793_v63  ;;  %v1798_v19 = vsub.f32 %v1786_v12, %v1793_v63 }
 0x302   : > { %v1799_v54 = vmul.f32 %v1795_v46, %v1795_v46  ;;  %v1800_v55 = vmul.f32 %v1796_v47, %v1796_v47  ;;  %v1801_v48 = vmul.f32 %v1797_v45, %v1797_v45  ;;  %v1802_v56 = vmul.f32 %v1798_v19, %v1798_v19 }
 0x304   : > { %v1803_v21 = vadd.f32 %v1799_v54, %v1766_v52  ;;  %v1804_v10 = vadd.f32 %v1800_v55, %v1767_v17  ;;  %v1805_v49 = vadd.f32 %v1801_v48, %v1768_v26  ;;  %v1806_v16 = vadd.f32 %v1802_v56, %v1769_v53 }
 0x306   : > { %v1807_v60 = vsub.f32 0.0, %v1803_v21  ;;  %v1808_v41 = vsub.f32 0.0, %v1804_v10  ;;  %v1809_v45 = vsub.f32 0.0, %v1805_v49  ;;  %v1810_v19 = vsub.f32 0.0, %v1806_v16 }
 0x308   : > { %v1811_v54 = vmul.f32 25.0, %v1807_v60 }
 0x315   : > { %v1826_v63 = vpop.permute.xlu0 %1825  ;;  %v1838_v46 = vpop.permute.xlu1 %1837 }
 0x316   : > { %v1828_v31 = vsub.f32 %v1703_v9, %v1826_v63  ;;  %v1829_v30 = vsub.f32 %v1707_v1, %v1826_v63  ;;  %v1830_v50 = vsub.f32 %v1711_v59, %v1826_v63  ;;  %v1831_v27 = vsub.f32 %v1715_v62, %v1826_v63 }
 0x317   : > { %v1840_v40 = vsub.f32 %v1737_v34, %v1838_v46  ;;  %v1841_v35 = vsub.f32 %v1741_v28, %v1838_v46  ;;  %v1842_v51 = vsub.f32 %v1745_v14, %v1838_v46  ;;  %v1843_v7 = vsub.f32 %v1749_v24, %v1838_v46 }
 0x318   : > { %v1832_v29 = vmul.f32 %v1828_v31, %v1828_v31  ;;  %v1833_v47 = vmul.f32 %v1829_v30, %v1829_v30  ;;  %v1834_v26 = vmul.f32 %v1830_v50, %v1830_v50  ;;  %v1835_v53 = vmul.f32 %v1831_v27, %v1831_v27 }
 0x319   : > { %v1844_v55 = vmul.f32 %v1840_v40, %v1840_v40  ;;  %v1845_v48 = vmul.f32 %v1841_v35, %v1841_v35  ;;  %v1846_v56 = vmul.f32 %v1842_v51, %v1842_v51  ;;  %v1812_v9 = vmul.f32 25.0, %v1808_v41 }
 0x31a   : > { %v1854_v58 = vpop.permute.xlu1 %1853  ;;  %v1847_v1 = vmul.f32 %v1843_v7, %v1843_v7  ;;  %v1813_v34 = vmul.f32 25.0, %v1809_v45  ;;  %v1814_v28 = vmul.f32 25.0, %v1810_v19  ;;  %v1815_v63 = vmul.f32 1.442695, %v1811_v54 }
 0x31b   : > { %v1856_v59 = vsub.f32 %v5015_v23, %v1854_v58  ;;  %v1857_v62 = vsub.f32 %v1778_v2, %v1854_v58  ;;  %v1858_v14 = vsub.f32 %v1782_v5, %v1854_v58  ;;  %v1859_v49 = vsub.f32 %v1786_v12, %v1854_v58 }
 0x31c   : > { %v1848_v39 = vadd.f32 %v1844_v55, %v1832_v29  ;;  %v1849_v60 = vadd.f32 %v1845_v48, %v1833_v47  ;;  %v1850_v25 = vadd.f32 %v1846_v56, %v1834_v26  ;;  %v1851_v21 = vadd.f32 %v1847_v1, %v1835_v53 }
 0x31d   : > { %v1860_v43 = vmul.f32 %v1856_v59, %v1856_v59  ;;  %v1861_v52 = vmul.f32 %v1857_v62, %v1857_v62  ;;  %v3372_v24 = vpop.f32.mrb[14].mxu0  ;;  %v1862_v17 = vmul.f32 %v1858_v14, %v1858_v14  ;;  %v1863_v10 = vmul.f32 %v1859_v49, %v1859_v49 }
 0x31e   : > { %v3373_v16 = vpop.f32.mrb[15].mxu0  ;;  %v1817_v2 = vmul.f32 1.442695, %v1812_v9  ;;  %v1819_v12 = vmul.f32 1.442695, %v1813_v34  ;;  %3944 = vpow2.f32 %v1815_v63 }
 0x31f   : > { %v1864_v46 = vadd.f32 %v1860_v43, %v1848_v39  ;;  %v1865_v31 = vadd.f32 %v1861_v52, %v1849_v60  ;;  %v3407_v30 = vpop.f32.mrb[18].mxu1  ;;  %v3374_v23 = vadd.f32 %v3373_v16, %v3372_v24  ;;  %v1866_v50 = vadd.f32 %v1862_v17, %v1850_v25 }
 0x320   : > { %v1867_v27 = vadd.f32 %v1863_v10, %v1851_v21  ;;  %v3408_v5 = vpop.f32.mrb[19].mxu1  ;;  %v1821_v51 = vmul.f32 1.442695, %v1814_v28  ;;  %3946 = vpow2.f32 %v1817_v2 }
 0x321   : > { %v1868_v41 = vsub.f32 0.0, %v1864_v46  ;;  %v1869_v40 = vsub.f32 0.0, %v1865_v31  ;;  %v3409_v35 = vadd.f32 %v3408_v5, %v3407_v30  ;;  %v1870_v45 = vsub.f32 0.0, %v1866_v50 }
 0x322   : > { %v1871_v19 = vsub.f32 0.0, %v1867_v27  ;;  %3948 = vpow2.f32 %v1819_v12 }
 0x323   : > { %v1872_v29 = vmul.f32 25.0, %v1868_v41  ;;  %v1873_v47 = vmul.f32 25.0, %v1869_v40  ;;  %v5022_v7 = vadd.f32 %v3409_v35, %v3374_v23  ;;  %v1874_v54 = vmul.f32 25.0, %v1870_v45 }
 0x324   : > { %v1875_v55 = vmul.f32 25.0, %v1871_v19  ;;  %3950 = vpow2.f32 %v1821_v51 }
 0x325   : > { %v1876_v26 = vmul.f32 1.442695, %v1872_v29  ;;  %v1878_v53 = vmul.f32 1.442695, %v1873_v47  ;;  %v1880_v48 = vmul.f32 1.442695, %v1874_v54 }
 0x326   : > { %v1882_v56 = vmul.f32 1.442695, %v1875_v55 }
 0x327   : > { %3952 = vpow2.f32 %v1876_v26 }
 0x328   : > { %3954 = vpow2.f32 %v1878_v53  ;;  %v3945_v58 = vpop.eup %3944 }
 0x329   : > { %3956 = vpow2.f32 %v1880_v48  ;;  %v1884_v28 = vsub.f32 1.0, %v3945_v58 }
 0x32a   : > { %3958 = vpow2.f32 %v1882_v56  ;;  %v3947_v9 = vpop.eup %3946 }
 0x32b   : > { %v1885_v39 = vsub.f32 1.0, %v3947_v9 }
 0x32c   : > { %v3949_v1 = vpop.eup %3948 }
 0x32d   : > { %v1886_v52 = vsub.f32 1.0, %v3949_v1 }
 0x32e   : > { %v3951_v59 = vpop.eup %3950 }
 0x32f   : > { %v1887_v17 = vsub.f32 1.0, %v3951_v59 }
 0x331   : > { %v5024_v62 = vpop.eup %3952 }
 0x332   : > { %v5026_v34 = vpop.eup %3954  ;;  %v1888_v14 = vsub.f32 1.0, %v5024_v62  ;;  %v1916_v25 = vrot.slane %v5024_v62, 7 }
 0x333   : > { %v5029_v49 = vpop.eup %3956  ;;  %v1889_v60 = vsub.f32 1.0, %v5026_v34  ;;  %v1917_v16 = vrot.slane %v5026_v34, 7 }
 0x334   : > { %v5032_v43 = vpop.eup %3958  ;;  %v1892_v24 = vmul.f32 %v1888_v14, %v1884_v28  ;;  %v1890_v21 = vsub.f32 1.0, %v5029_v49  ;;  %v1918_v23 = vrot.slane %v5029_v49, 7 }
 0x335   : > { %v1893_v10 = vmul.f32 %v1889_v60, %v1885_v39  ;;  %v1891_v63 = vsub.f32 1.0, %v5032_v43  ;;  %v1919_v5 = vrot.slane %v5032_v43, 7 }
 0x336   : > { %v1900_v46 = vrot.slane %v1892_v24, 7  ;;  %v1924_v31 = vmul.f32 %v1916_v25, %v1892_v24  ;;  %v1894_v30 = vmul.f32 %v1890_v21, %v1886_v52 }
 0x337   : > { %v1901_v2 = vrot.slane %v1893_v10, 7  ;;  %v1925_v50 = vmul.f32 %v1917_v16, %v1893_v10  ;;  %v1895_v27 = vmul.f32 %v1891_v63, %v1887_v17  ;;  %v476_v63 = vpop.permute.xlu1 %475 }
 0x338   : > { %v1908_v12 = vmul.f32 %v1900_v46, %v1892_v24  ;;  %v1928_v41 = vadd.f32 %v5024_v62, %v1924_v31  ;;  %v1902_v40 = vrot.slane %v1894_v30, 7  ;;  %v1926_v35 = vmul.f32 %v1918_v23, %v1894_v30 }
 0x339   : > { %v1909_v51 = vmul.f32 %v1901_v2, %v1893_v10  ;;  %v1929_v45 = vadd.f32 %v5026_v34, %v1925_v50  ;;  %v1903_v19 = vrot.slane %v1895_v27, 7  ;;  %v1927_v29 = vmul.f32 %v1919_v5, %v1895_v27  ;;  %v5046_v50 = vpop.permute.xlu0 %2606 }
 0x33a   : > { %v1936_v47 = vrot.slane %v1908_v12, 7  ;;  %v1952_v54 = vrot.slane %v1928_v41, 7  ;;  %v1910_v55 = vmul.f32 %v1902_v40, %v1894_v30  ;;  %v1930_v26 = vadd.f32 %v5029_v49, %v1926_v35 }
 0x33b   : > { %v1937_v53 = vrot.slane %v1909_v51, 7  ;;  %v1953_v48 = vrot.slane %v1929_v45, 7  ;;  %v1911_v56 = vmul.f32 %v1903_v19, %v1895_v27  ;;  %v1931_v58 = vadd.f32 %v5032_v43, %v1927_v29 }
 0x33c   : > { %v1944_v9 = vmul.f32 %v1936_v47, %v1892_v24  ;;  %v1960_v1 = vmul.f32 %v1952_v54, %v1892_v24  ;;  %v1938_v59 = vrot.slane %v1910_v55, 7  ;;  %v1954_v28 = vrot.slane %v1930_v26, 7 }
 0x33d   : > { %v1945_v14 = vmul.f32 %v1937_v53, %v1893_v10  ;;  %v1961_v39 = vmul.f32 %v1953_v48, %v1893_v10  ;;  %v1939_v60 = vrot.slane %v1911_v56, 7  ;;  %v1955_v52 = vrot.slane %v1931_v58, 7 }
 0x33e   : > { %v1964_v25 = vadd.f32 %v5024_v62, %v1960_v1  ;;  %v1972_v21 = vrot.slane %v1944_v9, 7  ;;  %v1946_v17 = vmul.f32 %v1938_v59, %v1894_v30  ;;  %v1962_v16 = vmul.f32 %v1954_v28, %v1894_v30 }
 0x33f   : > { %v1965_v46 = vadd.f32 %v5026_v34, %v1961_v39  ;;  %v1973_v31 = vrot.slane %v1945_v14, 7  ;;  %v1947_v23 = vmul.f32 %v1939_v60, %v1895_v27  ;;  %v1963_v2 = vmul.f32 %v1955_v52, %v1895_v27  ;;  %v5058_v39 = vpop.permute.xlu0 %2616 }
 0x340   : > { %v1980_v5 = vmul.f32 %v1972_v21, %v1892_v24  ;;  %v1988_v12 = vrot.slane %v1964_v25, 7  ;;  %v1966_v41 = vadd.f32 %v5029_v49, %v1962_v16  ;;  %v1974_v40 = vrot.slane %v1946_v17, 7  ;;  %v5354_v25 = vld [vmem:[#allocation3_spill] sm:$0xff] }
 0x341   : > { %v1981_v35 = vmul.f32 %v1973_v31, %v1893_v10  ;;  %v1989_v51 = vrot.slane %v1965_v46, 7  ;;  %v1967_v45 = vadd.f32 %v5032_v43, %v1963_v2  ;;  %v1975_v19 = vrot.slane %v1947_v23, 7 }
 0x342   : > { %v597_v29 = vadd.f32 %v4282_v13, %v476_v63  ;;  %v1996_v47 = vmul.f32 %v1988_v12, %v1892_v24  ;;  %v1982_v54 = vmul.f32 %v1974_v40, %v1894_v30  ;;  %v1990_v55 = vrot.slane %v1966_v41, 7 }
 0x343   : > { %v751_v26 = vadd.f32 %v4310_v37, %v476_v63  ;;  %v1997_v53 = vmul.f32 %v1989_v51, %v1893_v10  ;;  %v1983_v48 = vmul.f32 %v1975_v19, %v1895_v27  ;;  %v1991_v56 = vrot.slane %v1967_v45, 7 }
 0x344   : > { %v674_v58 = vadd.f32 %v4308_v36, %v476_v63  ;;  %v2000_v9 = vadd.f32 %v5024_v62, %v1996_v47  ;;  %v2007_v1 = vrot.slane %v1980_v5, %v5011_v61  ;;  %v1998_v59 = vmul.f32 %v1990_v55, %v1894_v30 }
 0x345   : > { %v2001_v28 = vadd.f32 %v5026_v34, %v1997_v53  ;;  %v2011_v14 = vrot.slane %v1981_v35, %v5011_v61  ;;  %v1999_v13 = vmul.f32 %v1991_v56, %v1895_v27  ;;  %v595_v24 = vadd.f32 %v4280_v11, %v476_v63 }
 0x346   : > { %v5061_v37 = vadd.f32 %v4306_v33, %v476_v63  ;;  %v2027_v10 = vrot.slane %v2000_v9, %v5011_v61  ;;  %v2002_v36 = vadd.f32 %v5029_v49, %v1998_v59  ;;  %v2015_v62 = vrot.slane %v1982_v54, %v5011_v61  ;;  %v5355_v49 = vld [vmem:[#allocation4_spill] sm:$0xff] }
 0x347   : > { %v2031_v30 = vrot.slane %v2001_v28, %v5011_v61  ;;  %v2003_v34 = vadd.f32 %v5032_v43, %v1999_v13  ;;  %v2019_v60 = vrot.slane %v1983_v48, %v5011_v61  ;;  %v672_v27 = vadd.f32 %v4304_v32, %v476_v63 }
 0x348   : > { %v2020_v11 = vmul.f32 %v2007_v1, %v595_v24  ;;  %v2040_v52 = vmul.f32 %v2027_v10, %v5061_v37  ;;  %v826_v33 = vadd.f32 %v5354_v25, %v476_v63  ;;  %v2035_v21 = vrot.slane %v2002_v36, %v5011_v61 }
 0x349   : > { %v2021_v17 = vmul.f32 %v2011_v14, %v597_v29  ;;  %v2041_v16 = vmul.f32 %v2031_v30, %v751_v26  ;;  %v828_v46 = vadd.f32 %v5355_v49, %v476_v63  ;;  %v2039_v31 = vrot.slane %v2003_v34, %v5011_v61  ;;  %v5389_v61 = vld [vmem:[#allocation17_spill] sm:$0xff]  ;;  %v5392_v63 = vld [vmem:[#allocation18_spill] sm:$0xff]  ;;  %v2592_v30 = vld [vmem:[%s5214_s7 + $0x8] sm:$0xff] }
 0x34a   : > { %v1485_v23 = vpop.xlane.xlu0 %1484  ;;  %v2044_v2 = vadd.f32 %v2040_v52, %v2020_v11  ;;  %v2022_v43 = vmul.f32 %v2015_v62, %v672_v27  ;;  %v2042_v5 = vmul.f32 %v2035_v21, %v826_v33  ;;  %v2023_v32 = vmul.f32 %v2019_v60, %v674_v58  ;;  %v2591_v62 = vld [vmem:[%s5214_s7] sm:$0xff]  ;;  %v2593_v34 = vld [vmem:[%s5214_s7 + $0x10] sm:$0xff]  ;;  %v2594_v60 = vld [vmem:[%s5214_s7 + $0x18] sm:$0xff]  ;;  %v2602_v52 = vpop.permute.xlu1 %2601 }
 0x34b   : > { %3960 = vrcp.f32 %v1485_v23  ;;  %v2045_v12 = vadd.f32 %v2041_v16, %v2021_v17  ;;  %v2043_v41 = vmul.f32 %v2039_v31, %v828_v46  ;;  %v5356_v51 = vmov 1.0|1.0  }
 0x34c   : > { %v2046_v40 = vadd.f32 %v2042_v5, %v2022_v43  ;;  %v5397_v47 = vmov 0.0  }
 0x34d   : > { %2374 = vmatprep.mubr.f32.mxu0 %v2045_v12  ;;  %v2047_v35 = vadd.f32 %v2043_v41, %v2023_v32 }
 0x34e   : > { %2375 = vmatmul.mubr.f32.vlgmr.msra.gmra.mrb[16].mxu0 %v2044_v2  ;;  %v2612_v32 = vpop.permute.xlu1 %2611 }
 0x34f   : > { %2444 = vmatprep.mubr.f32.mxu1 %v2047_v35  ;;  %3809 = vmatpush3.bf16.msk.msra.mxu0 %vm4656_vm13, %v5356_v51  ;;  %vm5359_vm13 = vnez %v5287_v20  ;;  %v5373_v20 = vld [vmem:[#allocation9_spill] sm:$0xff] }
 0x350   : > { %2445 = vmatmul.mubr.f32.vlgmr.msra.gmra.mrb[20].mxu1 %v2046_v40  ;;  %2514 = vmatprep.mubr.f32.mxu0 %v751_v26 }
 0x351   : > { %3841 = vmatpush3.bf16.msk.msra.mxu1 %vm4669_vm15, %v5356_v51  ;;  %2584 = vmatprep.mubr.f32.mxu1 %v828_v46  ;;  %vm5360_vm15 = vnez %v5291_v4  ;;  %v5377_v4 = vld [vmem:[#allocation10_spill] sm:$0xff] }
 0x352   : > { %3811 = vmatprep.subr.msk.bf16.mxu0 %vm4680_vm4, %v5356_v51  ;;  %3843 = vmatprep.subr.msk.bf16.mxu1 %vm4691_vm9, %v5356_v51  ;;  %vm5361_vm4 = vnez %v5293_v3  ;;  %vm5362_vm9 = vcmask 19456   ;;  %v5379_v3 = vld [vmem:[#allocation12_spill] sm:$0xff] }
 0x353   : > { %3813 = vmatpush3.bf16.msk.msra.mxu0 %vm5357_vm7, %v5356_v51  ;;  %vm5372_vm7 = vnez %v5371_v42 }
 0x354   : > { %3815 = vmatprep.subr.msk.bf16.mxu0 %vm5358_vm11, %v5356_v51  ;;  %vm5374_vm11 = vnez %v5373_v20 }
 0x355   : > { %v3961_v44 = vpop.eup %3960  ;;  %3845 = vmatpush3.bf16.msk.msra.mxu1 %vm5359_vm13, %v5356_v51  ;;  %vm5376_vm13 = vnez %v5375_v38 }
 0x356   : > { %v1691_v57 = vmul.f32 %v3961_v44, %v5022_v7  ;;  %3847 = vmatprep.subr.msk.bf16.mxu1 %vm5360_vm15, %v5356_v51  ;;  %vm5378_vm15 = vnez %v5377_v4 }
 0x357   : > { %3817 = vmatpush3.bf16.msk.msra.mxu0 %vm5361_vm4, %v5356_v51  ;;  %vm5380_vm4 = vnez %v5379_v3  ;;  %v2733_v3 = vld [vmem:[%s5216_s9] sm:$0x1] }
 0x358   : > { %2995 = vst.msk [vmem:[%s4588_s29 + $0x8] sm:$0xf] %vm5362_vm9, %v1691_v57  ;;  %3819 = vmatprep.subr.msk.bf16.mxu0 %vm5363_vm10, %v5356_v51  ;;  %vm5382_vm9 = vnez %v5381_v0  ;;  %vm5384_vm10 = vnez %v5383_v18  ;;  %s2967_s29 = sshll.u32 %s5402_s24, 2  ;;  %v2738_v0 = vpop.permute.xlu1 %2737  ;;  %v5398_v18 = vld [vmem:[#allocation23_spill] sm:$0xff] }
 0x359   : > { %3849 = vmatpush3.bf16.msk.msra.mxu1 %vm5364_vm5, %v5356_v51  ;;  %vm5386_vm5 = vnez %v5385_v15  ;;  %s448_s17 = scalar_lea.vmem %s5213_s6, %s2967_s29  ;;  %v2743_v15 = vrot.slane %v2738_v0, %v5398_v18  ;;  %s457_s29 = scalar_lea.vmem %s5219_s12, %s2969_s30 }
 0x35a   : > { %3851 = vmatprep.subr.msk.bf16.mxu1 %vm5365_vm12, %v5356_v51  ;;  %vm5388_vm12 = vnez %v5387_v22  ;;  %v2590_v24 = vld [vmem:[%s448_s17] sm:$0x7] }
 0x35b   : > { %3821 = vmatpush3.bf16.msk.msra.mxu0 %vm5366_vm6, %v5356_v51  ;;  %vm5390_vm6 = vnez %v5389_v61 }
 0x35c   : > { %3823 = vmatprep.subr.msk.bf16.mxu0 %vm5368_vm1, %v5356_v51  ;;  %vm5393_vm1 = vnez %v5392_v63 }
 0x35d   : > { %3853 = vmatpush3.bf16.msk.msra.mxu1 %vm5370_vm0, %v5356_v51  ;;  %vm2744_vm0 = vcmask 261120  }
 0x35e   : > { %3855 = vmatprep.subr.msk.bf16.mxu1 %vm5372_vm7, %v5356_v51 }
 0x35f   : > { %3825 = vmatpush3.bf16.msk.msra.mxu0 %vm5374_vm11, %v5356_v51 }
 0x360   : > { %3827 = vmatprep.subr.msk.bf16.mxu0 %vm5376_vm13, %v5356_v51 }
 0x361   : > { %3857 = vmatpush3.bf16.msk.msra.mxu1 %vm5378_vm15, %v5356_v51 }
 0x362   : > { %3859 = vmatprep.subr.msk.bf16.mxu1 %vm5380_vm4, %v5356_v51 }
 0x363   : > { %3829 = vmatpush3.bf16.msk.msra.mxu0 %vm5382_vm9, %v5356_v51 }
 0x364   : > { %3831 = vmatprep.subr.msk.bf16.mxu0 %vm5384_vm10, %v5356_v51 }
 0x365   : > { %3861 = vmatpush3.bf16.msk.msra.mxu1 %vm5386_vm5, %v5356_v51 }
 0x366   : > { %3863 = vmatprep.subr.msk.bf16.mxu1 %vm5388_vm12, %v5356_v51 }
 0x367   : > { %3833 = vmatpush3.bf16.msk.msra.mxu0 %vm5390_vm6, %v5356_v51 }
 0x368   : > { %3835 = vmatprep.subr.msk.bf16.mxu0 %vm4957_vm3, %v5356_v51  ;;  %vm3983_vm3 = vmmov 1  }
 0x369   : > { %3865 = vmatpush3.bf16.msk.msra.mxu1 %vm5393_vm1, %v5356_v51 }
 0x36a   : > { %3867 = vmatprep.subr.msk.bf16.mxu1 %vm4967_vm14, %v5356_v51  ;;  %vm2632_vm14 = vcmask 1042432  }
 0x36b   : > { %3837 = vmatpush3.bf16.msk.msra.mxu0 %vm4975_vm8, %v5356_v51  ;;  %vm3871_vm8 = vmpackc.low %vm2632_vm14, %vm3983_vm3 }
 0x36d   : > { %3869 = vmatpush3.bf16.msk.msra.mxu1 %vm4982_vm2, %v5356_v51  ;;  %vm2619_vm2 = vcmask 89088  }
 0x36e   : > { %2515 = vmatmul.mubr.f32.vlgmr.msra.gmra.mrb[18].mxu0 %v5061_v37 }
 0x36f   : > { %2700 = vmatprep.mubr.f32.mxu0 %v5397_v47 }
 0x370   : > { %2585 = vmatmul.mubr.f32.vlgmr.msra.gmra.mrb[22].mxu1 %v826_v33 }
 0x371   : > { %2812 = vmatprep.mubr.f32.mxu1 %v5397_v47 }
 0x421   : > { %v3442_v54 = vpop.f32.mrb[16].mxu0 }
 0x422   : > { %v3443_v55 = vpop.f32.mrb[17].mxu0 }
 0x423   : > { %v3477_v26 = vpop.f32.mrb[20].mxu1  ;;  %v3444_v53 = vadd.f32 %v3443_v55, %v3442_v54 }
 0x424   : > { %v3478_v48 = vpop.f32.mrb[21].mxu1 }
 0x425   : > { %v3479_v56 = vadd.f32 %v3478_v48, %v3477_v26 }
 0x427   : > { %v2447_v58 = vadd.f32 %v3479_v56, %v3444_v53  ;;  %v3984_v53 = vmov 1966171168  }
 0x428   : > { %v2835_v48 = vunpack.c.l.s4 %v3984_v53 }
 0x429   : > { %v3873_v36 = vpack.c.bf16 %v2590_v24, %v2447_v58 }
 0x42a   : > { %v2836_v56 = vunpack.c.0.s8 %v2835_v48 }
 0x441   : > { %v3512_v9 = vpop.f32.mrb[18].mxu0 }
 0x442   : > { %v3513_v1 = vpop.f32.mrb[19].mxu0 }
 0x443   : > { %v3547_v59 = vpop.f32.mrb[22].mxu1  ;;  %v3514_v28 = vadd.f32 %v3513_v1, %v3512_v9  ;;  %v5399_v9 = vld [vmem:[#allocation5_spill] sm:$0xff] }
 0x444   : > { %v3548_v14 = vpop.f32.mrb[23].mxu1  ;;  %v2839_v1 = vsub.s32 %v2836_v56, %v5399_v9 }
 0x445   : > { %v3549_v13 = vadd.f32 %v3548_v14, %v3547_v59 }
 0x447   : > { %v2587_v37 = vadd.f32 %v3549_v13, %v3514_v28  ;;  %v5400_v13 = vlaneseq }
 0x449   : > { %v3870_v10 = vpack.c.bf16 %v2590_v24, %v2587_v37  ;;  %vm2851_vm7 = vcmp.lt.s32.totalorder %v5400_v13, 256 }
 0x44b   : > { %3872 = vmatprep.subr.msk.bf16.mxu0 %vm3871_vm8, %v3870_v10 }
 0x44c   : > { %3875 = vmatpush1.bf16.msk.msra.mxu0 %vm3871_vm8, %v3873_v36 }
 0x44f   : > { %3193 = vmatmul.mubr.msk.f32.vlgmr.msra.gmra.mrb[20].mxu0 %vm2619_vm2, %v2591_v62 }
 0x450   : > { %2706 = vmatprep.mubr.f32.mxu0 %v5397_v47 }
 0x453   : > { %3194 = vmatmul.mubr.msk.f32.gmra.mrb[22].mxu0 %vm2619_vm2, %v2592_v30 }
 0x454   : > { %2712 = vmatprep.mubr.f32.mxu0 %v5397_v47 }
 0x457   : > { %3195 = vmatmul.mubr.msk.f32.gmra.mrb[24].mxu0 %vm2619_vm2, %v2593_v34 }
 0x458   : > { %2718 = vmatprep.mubr.f32.mxu0 %v5397_v47 }
 0x45b   : > { %3196 = vmatmul.mubr.msk.f32.gmra.mrb[26].mxu0 %vm2619_vm2, %v2594_v60 }
 0x522   : > { %v2702_v27 = vpop.f32.mrb[20].mxu0 }
 0x523   : > { %v2704_v11 = vpop.f32.mrb[21].mxu0  ;;  %v2703_v25 = vadd.f32 %v2702_v27, %v2602_v52 }
 0x524   : > { %v2705_v33 = vadd.f32 %v2704_v11, %v2602_v52 }
 0x525   : > { %v2725_v46 = vmax.f32 %v2703_v25, 0.0 }
 0x526   : > { %v2708_v21 = vpop.f32.mrb[22].mxu0  ;;  %v2726_v23 = vmax.f32 %v2705_v33, 0.0 }
 0x527   : > { %v2709_v17 = vadd.f32 %v2708_v21, %v5046_v50  ;;  %v2710_v16 = vpop.f32.mrb[23].mxu0 }
 0x528   : > { %v2711_v49 = vadd.f32 %v2710_v16, %v5046_v50 }
 0x529   : > { %v2727_v31 = vmax.f32 %v2709_v17, 0.0 }
 0x52a   : > { %v2728_v2 = vmax.f32 %v2711_v49, 0.0  ;;  %v2714_v43 = vpop.f32.mrb[24].mxu0 }
 0x52b   : > { %v3878_v5 = vpack.c.bf16 %v2727_v31, %v2725_v46  ;;  %v2716_v12 = vpop.f32.mrb[25].mxu0  ;;  %v2715_v40 = vadd.f32 %v2714_v43, %v2612_v32 }
 0x52c   : > { %v3876_v41 = vpack.c.bf16 %v2728_v2, %v2726_v23  ;;  %v2717_v35 = vadd.f32 %v2716_v12, %v2612_v32 }
 0x52d   : > { %v2729_v50 = vmax.f32 %v2715_v40, 0.0 }
 0x52e   : > { %v2720_v51 = vpop.f32.mrb[26].mxu0  ;;  %3877 = vmatprep.subr.bf16.mxu1 %v3876_v41  ;;  %v2730_v42 = vmax.f32 %v2717_v35, 0.0 }
 0x52f   : > { %v2721_v44 = vadd.f32 %v2720_v51, %v5058_v39  ;;  %v2722_v57 = vpop.f32.mrb[27].mxu0  ;;  %3879 = vmatpush1.bf16.msra.mxu1 %v3878_v5 }
 0x530   : > { %v2723_v6 = vadd.f32 %v2722_v57, %v5058_v39 }
 0x531   : > { %v2731_v8 = vmax.f32 %v2721_v44, 0.0 }
 0x532   : > { %v2732_v20 = vmax.f32 %v2723_v6, 0.0 }
 0x533   : > { %v3882_v38 = vpack.c.bf16 %v2731_v8, %v2729_v50 }
 0x534   : > { %v3880_v4 = vpack.c.bf16 %v2732_v20, %v2730_v42 }
 0x536   : > { %3881 = vmatprep.subr.bf16.mxu1 %v3880_v4 }
 0x537   : > { %3883 = vmatpush1.bf16.msra.mxu1 %v3882_v38 }
 0x53a   : > { %3197 = vmatmul.mubr.msk.f32.vlgmr.msra.gmra.mrb[24].mxu1 %vm2744_vm0, %v2733_v3 }
 0x60d   : > { %v2814_v22 = vpop.f32.mrb[24].mxu1 }
 0x60e   : > { %v2815_v61 = vadd.f32 %v2814_v22, %v2743_v15  ;;  %v2816_v39 = vpop.f32.mrb[25].mxu1 }
 0x60f   : > { %v2817_v7 = vadd.f32 %v2816_v39, %v2743_v15 }
 0x610   : > { %v2819_v63 = vsub.f32 0.0, %v2815_v61 }
 0x611   : > { %v2820_v45 = vsub.f32 0.0, %v2817_v7 }
 0x612   : > { %v2821_v19 = vmul.f32 1.442695, %v2819_v63 }
 0x613   : > { %v2823_v29 = vmul.f32 1.442695, %v2820_v45 }
 0x614   : > { %3962 = vpow2.f32 %v2821_v19 }
 0x615   : > { %3964 = vpow2.f32 %v2823_v29 }
 0x61e   : > { %v3963_v47 = vpop.eup %3962 }
 0x61f   : > { %v3965_v54 = vpop.eup %3964  ;;  %v2825_v55 = vadd.f32 1.0, %v3963_v47 }
 0x620   : > { %v2826_v26 = vadd.f32 1.0, %v3965_v54 }
 0x621   : > { %3966 = vrcp.f32 %v2825_v55 }
 0x622   : > { %3968 = vrcp.f32 %v2826_v26 }
 0x62b   : > { %v3967_v58 = vpop.eup %3966 }
 0x62c   : > { %v3969_v59 = vpop.eup %3968 }
 0x62d   : > { %v2833_v28 = vcombine.low %v3967_v58, %v3969_v59 }
 0x62f   : > { %v2840_v14 = vrot.slane %v2833_v28, %v2839_v1 }
 0x631   : > { %v2847_v24 = vrot.slane %v2840_v14, %v2839_v1 }
 0x633   : > { %2853 = vst.msk [vmem:[%s457_s29] sm:$0x3] %vm2851_vm7, %v2847_v24 }
 0x634 PF: > { %s25_s23 = sadd.s32 1, %s3976_s23  }
 0x635   : > { %p22_p4 = scmp.ge.s32.totalorder %s25_s23, 4  }
 0x637   :  { %24 = sbr.rel (!%p22_p4) target bundleno = 3 (0x3), region = 116 }

</bundles_post_ra>
